<compile_context>
chip_gen: v6e
topology: v6e:2x2x1
jax: 0.10.0
libtpu: 0.0.40
codegen_flags: <defaults>
</compile_context>

<pallas_src>
import math

import jax
import jax.numpy as jnp
from jax import lax
from jax.experimental import pallas as pl
from jax.experimental.pallas import tpu as pltpu


def _round_up(x, m):
    return ((x + m - 1) // m) * m


def _make_kernel(n_true, n_pad, tile_e, compute_dtype):
    """Build the CompGCN kernel closure (static node count & edge-tile size)."""

    def kernel(dst_in_ref, dst_out_ref, ein_ref, eout_ref, x_ref,
               in_w_ref, out_w_ref, loop_w_ref, loop_rel_ref,
               rel_ref, w_rel_ref, gamma_ref, beta_ref,
               x_out_ref, rel_out_ref):
        i = pl.program_id(0)

        @pl.when(i == 0)
        def _init():
            x_out_ref[...] = jnp.zeros_like(x_out_ref)

        # Node-row id plane reused by both scatter matmuls of this tile.
        # TODO(synk): tile the node dimension here (and the resident
        # accumulator) for very large N to stay inside v7x's 64 MiB VMEM.
        node_ids = lax.broadcasted_iota(jnp.int32, (n_pad, tile_e), 0)

        def scatter_tile(edge_ref, w_ref, dst_ref):
            # Per-tile messages on the MXU (edge_norm and the 1/3 scale are
            # already folded into edge_data / the weights on the host).
            msg = jnp.dot(edge_ref[...], w_ref[...],
                          preferred_element_type=jnp.float32)
            # One-hot scatter matmul: S[n, e] = (n == dst[e]).  Padded / OOB
            # destinations carry the -1 sentinel and match no node row.
            scat = (node_ids == dst_ref[...]).astype(compute_dtype)
            x_out_ref[...] += jnp.dot(scat, msg.astype(compute_dtype),
                                      preferred_element_type=jnp.float32)

        scatter_tile(ein_ref, in_w_ref, dst_in_ref)      # first half  -> in_w
        scatter_tile(eout_ref, out_w_ref, dst_out_ref)   # second half -> out_w

        @pl.when(i == pl.num_programs(0) - 1)
        def _finalize():
            # Self-loop term: (x * loop_rel) @ (loop_w / 3)
            loop = jnp.dot(x_ref[...] * loop_rel_ref[...], loop_w_ref[...],
                           preferred_element_type=jnp.float32)
            xo = x_out_ref[...] + loop

            # BatchNorm1d, training mode: batch stats over the true N rows only.
            # TODO(synk): chunk this epilogue over node-row blocks for large N
            # (vreg pressure); trivial at the demo sizes.
            row_ids = lax.broadcasted_iota(jnp.int32, (xo.shape[0], 1), 0)
            mask = (row_ids < n_true).astype(jnp.float32)
            inv_n = 1.0 / float(n_true)
            mean = jnp.sum(xo * mask, axis=0, keepdims=True) * inv_n
            diff = (xo - mean) * mask
            var = jnp.sum(diff * diff, axis=0, keepdims=True) * inv_n
            xn = (xo - mean) * lax.rsqrt(var + 1e-5)
            x_out_ref[...] = gamma_ref[...] * xn + beta_ref[...]

            # Relation transform (act = identity), once.
            rel_out_ref[...] = jnp.dot(rel_ref[...], w_rel_ref[...],
                                       preferred_element_type=jnp.float32)

    return kernel


def compgcn_forward(x, rel, edge_src, edge_dst, edge_type, edge_norm, params,
                    *, tile_e=512, compute_dtype=jnp.bfloat16,
                    vmem_limit_bytes=48 * 1024 * 1024):
    """CompGCNCov forward. Returns (x_out [N, Dout], rel_out [R, Dout])."""
    N, Din = x.shape
    R = rel.shape[0]
    E = edge_src.shape[0]
    Dout = params['in_w'].shape[1]

    dout_p = _round_up(Dout, 128)          # lane-dense output dim only
    n_p = _round_up(N, 8)
    r_p = _round_up(R, 8)

    n_in = E // 2
    n_out = E - n_in
    e_half_p = _round_up(max(n_in, n_out, 1), tile_e)
    num_tiles = e_half_p // tile_e

    # ---- host-side glue (gathers / elementwise only; all reductions & matmuls
    #      run inside the kernel).  norm is folded into the composition here.
    # TODO(synk): move this gather in-kernel (one_hot(src)@x, one_hot(type)@rel)
    # so only ~16 B/edge of indices is streamed instead of Din values/edge.
    edge_data = (x[edge_src] * rel[edge_type]) * edge_norm[:, None]

    def pad2(a, rows, cols):
        return jnp.pad(a, ((0, rows - a.shape[0]), (0, cols - a.shape[1])))

    ein = pad2(edge_data[:n_in], e_half_p, Din).astype(compute_dtype)
    eout = pad2(edge_data[n_in:], e_half_p, Din).astype(compute_dtype)

    # Destination streams as (1, e_half_p) int32 VMEM blocks; padded slots get
    # the -1 sentinel so the in-kernel one-hot matches no node row (this also
    # makes any out-of-range destination a silent drop rather than an OOB store).
    def pad_dst(d, n_real):
        out = jnp.full((1, e_half_p), -1, dtype=jnp.int32)
        return out.at[0, :n_real].set(d.astype(jnp.int32))

    dst_in = pad_dst(edge_dst[:n_in], n_in)
    dst_out = pad_dst(edge_dst[n_in:], n_out)

    x_p = pad2(x, n_p, Din).astype(compute_dtype)
    rel_p = pad2(rel, r_p, Din).astype(compute_dtype)

    third = jnp.float32(1.0 / 3.0)         # fold the /3 into the weights once
    in_w = pad2(params['in_w'] * third, Din, dout_p).astype(compute_dtype)
    out_w = pad2(params['out_w'] * third, Din, dout_p).astype(compute_dtype)
    loop_w = pad2(params['loop_w'] * third, Din, dout_p).astype(compute_dtype)
    w_rel = pad2(params['w_rel'], Din, dout_p).astype(compute_dtype)
    loop_rel = params['loop_rel'].astype(compute_dtype)            # (1, Din)
    gamma = pad2(params['gamma'], 1, dout_p).astype(jnp.float32)
    beta = pad2(params['beta'], 1, dout_p).astype(jnp.float32)

    kernel = _make_kernel(N, n_p, tile_e, compute_dtype)

    def resident(shape):                   # VMEM-resident block (fetched once)
        return pl.BlockSpec(shape, lambda i, n=len(shape): (0,) * n)

    edge_spec = pl.BlockSpec((tile_e, Din), lambda i: (i, 0))   # Din unpadded
    dst_spec = pl.BlockSpec((1, tile_e), lambda i: (0, i))

    grid_spec = pltpu.PrefetchScalarGridSpec(
        num_scalar_prefetch=0,
        grid=(num_tiles,),
        in_specs=[
            dst_spec,                      # dst_in  (pipelined edge stream)
            dst_spec,                      # dst_out (pipelined edge stream)
            edge_spec,                     # ein     (pipelined edge stream)
            edge_spec,                     # eout    (pipelined edge stream)
            resident((n_p, Din)),          # x
            resident((Din, dout_p)),       # in_w   (pre-scaled by 1/3)
            resident((Din, dout_p)),       # out_w  (pre-scaled by 1/3)
            resident((Din, dout_p)),       # loop_w (pre-scaled by 1/3)
            resident((1, Din)),            # loop_rel
            resident((r_p, Din)),          # rel
            resident((Din, dout_p)),       # w_rel
            resident((1, dout_p)),         # gamma
            resident((1, dout_p)),         # beta
        ],
        out_specs=[
            resident((n_p, dout_p)),       # x_out (node accumulator, P3)
            resident((r_p, dout_p)),       # rel_out
        ],
    )

    # TODO(synk): on v7x, add a leading size-2 "parallel" grid axis with
    # per-shard accumulators + a final combine to use both TensorCores.
    x_out_p, rel_out_p = pl.pallas_call(
        kernel,
        out_shape=(jax.ShapeDtypeStruct((n_p, dout_p), jnp.float32),
                   jax.ShapeDtypeStruct((r_p, dout_p), jnp.float32)),
        grid_spec=grid_spec,
        compiler_params=pltpu.CompilerParams(
            dimension_semantics=("arbitrary",),   # reduction into accumulator
            vmem_limit_bytes=vmem_limit_bytes,
        ),
    )(dst_in, dst_out, ein, eout, x_p,
      in_w, out_w, loop_w, loop_rel,
      rel_p, w_rel, gamma, beta)

    return x_out_p[:N, :Dout], rel_out_p[:R, :Dout]


def reference_forward(x, rel, edge_src, edge_dst, edge_type, edge_norm, params):
    """Pure-JAX reference mirroring the PyTorch/DGL forward."""
    E = edge_src.shape[0]
    half = E // 2
    edge_data = x[edge_src] * rel[edge_type]
    msg = jnp.concatenate([edge_data[:half] @ params['in_w'],
                           edge_data[half:] @ params['out_w']], axis=0)
    msg = msg * edge_norm[:, None]
    agg = jax.ops.segment_sum(msg, edge_dst, num_segments=x.shape[0])
    h = agg / 3.0
    xo = h + (x * params['loop_rel']) @ params['loop_w'] / 3.0
    mean = xo.mean(0, keepdims=True)
    var = ((xo - mean) ** 2).mean(0, keepdims=True)
    xn = (xo - mean) / jnp.sqrt(var + 1e-5)
    x_out = params['gamma'] * xn + params['beta']
    rel_out = rel @ params['w_rel']
    return x_out, rel_out


def xavier_normal(key, shape, gain):
    fan_out, fan_in = shape[0], shape[1]
    std = gain * math.sqrt(2.0 / (fan_in + fan_out))
    return std * jax.random.normal(key, shape, dtype=jnp.float32)


if __name__ == "__main__":
    # Small but non-trivial synthetic problem (exercises multiple edge tiles).
    N, E, R = 64, 2048, 16       # nodes, edges (even), relations
    Din, Dout = 32, 64           # in_channels, out_channels

    key = jax.random.PRNGKey(0)
    keys = jax.random.split(key, 12)
    gain = math.sqrt(2.0)        # nn.init.calculate_gain('relu')

    params = {
        'in_w':     xavier_normal(keys[0], (Din, Dout), gain),
        'out_w':    xavier_normal(keys[1], (Din, Dout), gain),
        'loop_w':   xavier_normal(keys[2], (Din, Dout), gain),
        'loop_rel': xavier_normal(keys[3], (1, Din), gain),
        'w_rel':    xavier_normal(keys[4], (Din, Dout), gain),
        'gamma':    jnp.ones((1, Dout), jnp.float32),   # BatchNorm1d defaults
        'beta':     jnp.zeros((1, Dout), jnp.float32),
    }

    x = jax.random.normal(keys[5], (N, Din), dtype=jnp.float32)
    rel_repr = jax.random.normal(keys[6], (R, Din), dtype=jnp.float32)
    edge_src = jax.random.randint(keys[7], (E,), 0, N)
    edge_dst = jax.random.randint(keys[8], (E,), 0, N)
    edge_type = jax.random.randint(keys[9], (E,), 0, R)
    edge_norm = jax.random.uniform(keys[10], (E,), dtype=jnp.float32)

    # Production fast path: bf16 streams / weights, f32 accumulation (default).
    x_bf, rel_bf = compgcn_forward(x, rel_repr, edge_src, edge_dst,
                                   edge_type, edge_norm, params, tile_e=512)
    jax.block_until_ready((x_bf, rel_bf))

    # f32 path for a tight numerical check against the f32 reference.
    x_f32, rel_f32 = compgcn_forward(x, rel_repr, edge_src, edge_dst,
                                     edge_type, edge_norm, params,
                                     tile_e=512, compute_dtype=jnp.float32)
    jax.block_until_ready((x_f32, rel_f32))

    x_ref, rel_ref = reference_forward(x, rel_repr, edge_src, edge_dst,
                                       edge_type, edge_norm, params)

    assert jnp.allclose(x_f32, x_ref, atol=2e-3, rtol=2e-3), "node output mismatch (f32)"
    assert jnp.allclose(rel_f32, rel_ref, atol=2e-3, rtol=2e-3), "rel output mismatch (f32)"
    assert jnp.allclose(x_bf, x_ref, atol=1.5e-1, rtol=1.5e-1), "node output mismatch (bf16)"
    assert jnp.allclose(rel_bf, rel_ref, atol=1.5e-1, rtol=1.5e-1), "rel output mismatch (bf16)"

    print("KERNEL_OK")
</pallas_src>

<mosaic_0001>
module attributes {stable_mosaic.version = 11 : i64} {
  func.func @kernel(%arg0: i32, %arg1: memref<1x512xi32, #tpu.memory_space<vmem>>, %arg2: memref<1x512xi32, #tpu.memory_space<vmem>>, %arg3: memref<512x32xbf16, #tpu.memory_space<vmem>>, %arg4: memref<512x32xbf16, #tpu.memory_space<vmem>>, %arg5: memref<64x32xbf16, #tpu.memory_space<vmem>>, %arg6: memref<32x128xbf16, #tpu.memory_space<vmem>>, %arg7: memref<32x128xbf16, #tpu.memory_space<vmem>>, %arg8: memref<32x128xbf16, #tpu.memory_space<vmem>>, %arg9: memref<1x32xbf16, #tpu.memory_space<vmem>>, %arg10: memref<16x32xbf16, #tpu.memory_space<vmem>>, %arg11: memref<32x128xbf16, #tpu.memory_space<vmem>>, %arg12: memref<1x128xf32, #tpu.memory_space<vmem>>, %arg13: memref<1x128xf32, #tpu.memory_space<vmem>>, %arg14: memref<64x128xf32, #tpu.memory_space<vmem>>, %arg15: memref<16x128xf32, #tpu.memory_space<vmem>>) attributes {dimension_semantics = [#tpu.dimension_semantics<arbitrary>], iteration_bounds = array<i64: 2>, scalar_prefetch = 0 : i64, scratch_operands = 0 : i64, tpu.core_type = #tpu.core_type<tc>, window_params = [{transform_indices = @transform_0, window_bounds = array<i64: 1, 512>}, {transform_indices = @transform_1, window_bounds = array<i64: 1, 512>}, {transform_indices = @transform_2, window_bounds = array<i64: 512, 32>}, {transform_indices = @transform_3, window_bounds = array<i64: 512, 32>}, {pipeline_mode = #tpu.pipeline_mode<synchronous>, transform_indices = @transform_4, window_bounds = array<i64: 64, 32>}, {pipeline_mode = #tpu.pipeline_mode<synchronous>, transform_indices = @transform_5, window_bounds = array<i64: 32, 128>}, {pipeline_mode = #tpu.pipeline_mode<synchronous>, transform_indices = @transform_6, window_bounds = array<i64: 32, 128>}, {pipeline_mode = #tpu.pipeline_mode<synchronous>, transform_indices = @transform_7, window_bounds = array<i64: 32, 128>}, {pipeline_mode = #tpu.pipeline_mode<synchronous>, transform_indices = @transform_8, window_bounds = array<i64: 1, 32>}, {pipeline_mode = #tpu.pipeline_mode<synchronous>, transform_indices = @transform_9, window_bounds = array<i64: 16, 32>}, {pipeline_mode = #tpu.pipeline_mode<synchronous>, transform_indices = @transform_10, window_bounds = array<i64: 32, 128>}, {pipeline_mode = #tpu.pipeline_mode<synchronous>, transform_indices = @transform_11, window_bounds = array<i64: 1, 128>}, {pipeline_mode = #tpu.pipeline_mode<synchronous>, transform_indices = @transform_12, window_bounds = array<i64: 1, 128>}, {pipeline_mode = #tpu.pipeline_mode<synchronous>, transform_indices = @transform_13, window_bounds = array<i64: 64, 128>}, {pipeline_mode = #tpu.pipeline_mode<synchronous>, transform_indices = @transform_14, window_bounds = array<i64: 16, 128>}]} {
    %c0_i32 = arith.constant 0 : i32
    %0 = arith.cmpi eq, %arg0, %c0_i32 : i32
    %1 = arith.extui %0 : i1 to i32
    %c0_i32_0 = arith.constant 0 : i32
    %2 = arith.cmpi ne, %1, %c0_i32_0 : i32
    scf.if %2 {
      %cst_24 = arith.constant 0.000000e+00 : f32
      %35 = vector.broadcast %cst_24 : f32 to vector<64x128xf32>
      %c0_25 = arith.constant 0 : index
      %c0_26 = arith.constant 0 : index
      %36 = vector.load %arg14[%c0_25, %c0_26] : memref<64x128xf32, #tpu.memory_space<vmem>>, vector<64x128xf32>
      tpu.vector_store %arg14[%c0_25, %c0_26], %35 {strides = array<i32>} : memref<64x128xf32, #tpu.memory_space<vmem>>, vector<64x128xf32>,
    } else {
    }
    %3 = tpu.iota {dimensions = array<i32: 0>} : vector<64x512xi32>
    %c0 = arith.constant 0 : index
    %c0_1 = arith.constant 0 : index
    %4 = vector.load %arg3[%c0, %c0_1] : memref<512x32xbf16, #tpu.memory_space<vmem>>, vector<512x32xbf16>
    %c0_2 = arith.constant 0 : index
    %c0_3 = arith.constant 0 : index
    %5 = vector.load %arg6[%c0_2, %c0_3] : memref<32x128xbf16, #tpu.memory_space<vmem>>, vector<32x128xbf16>
    %cst = arith.constant dense<0.000000e+00> : vector<512x128xf32>
    %6 = tpu.matmul %4, %5, %cst {dimension_numbers = #tpu.dot_dimension_numbers<[1], [0], [0], [1], [0, 0, 1, 1], [], []>} : vector<512x32xbf16>, vector<32x128xbf16>, vector<512x128xf32> -> vector<512x128xf32>
    %c0_4 = arith.constant 0 : index
    %c0_5 = arith.constant 0 : index
    %7 = vector.load %arg1[%c0_4, %c0_5] : memref<1x512xi32, #tpu.memory_space<vmem>>, vector<1x512xi32>
    %8 = vector.broadcast %7 : vector<1x512xi32> to vector<64x512xi32>
    %9 = arith.cmpi eq, %3, %8 : vector<64x512xi32>
    %10 = arith.extui %9 : vector<64x512xi1> to vector<64x512xi32>
    %11 = arith.sitofp %10 : vector<64x512xi32> to vector<64x512xf32>
    %12 = arith.truncf %11 : vector<64x512xf32> to vector<64x512xbf16>
    %c0_6 = arith.constant 0 : index
    %c0_7 = arith.constant 0 : index
    %13 = vector.load %arg14[%c0_6, %c0_7] : memref<64x128xf32, #tpu.memory_space<vmem>>, vector<64x128xf32>
    %14 = arith.truncf %6 : vector<512x128xf32> to vector<512x128xbf16>
    %cst_8 = arith.constant dense<0.000000e+00> : vector<64x128xf32>
    %15 = tpu.matmul %12, %14, %cst_8 {dimension_numbers = #tpu.dot_dimension_numbers<[1], [0], [0], [1], [0, 0, 1, 1], [], []>} : vector<64x512xbf16>, vector<512x128xbf16>, vector<64x128xf32> -> vector<64x128xf32>
    %16 = arith.addf %13, %15 : vector<64x128xf32>
    %c0_9 = arith.constant 0 : index
    %c0_10 = arith.constant 0 : index
    %17 = vector.load %arg14[%c0_9, %c0_10] : memref<64x128xf32, #tpu.memory_space<vmem>>, vector<64x128xf32>
    tpu.vector_store %arg14[%c0_9, %c0_10], %16 {strides = array<i32>} : memref<64x128xf32, #tpu.memory_space<vmem>>, vector<64x128xf32>,
    %c0_11 = arith.constant 0 : index
    %c0_12 = arith.constant 0 : index
    %18 = vector.load %arg4[%c0_11, %c0_12] : memref<512x32xbf16, #tpu.memory_space<vmem>>, vector<512x32xbf16>
    %c0_13 = arith.constant 0 : index
    %c0_14 = arith.constant 0 : index
    %19 = vector.load %arg7[%c0_13, %c0_14] : memref<32x128xbf16, #tpu.memory_space<vmem>>, vector<32x128xbf16>
    %cst_15 = arith.constant dense<0.000000e+00> : vector<512x128xf32>
    %20 = tpu.matmul %18, %19, %cst_15 {dimension_numbers = #tpu.dot_dimension_numbers<[1], [0], [0], [1], [0, 0, 1, 1], [], []>} : vector<512x32xbf16>, vector<32x128xbf16>, vector<512x128xf32> -> vector<512x128xf32>
    %c0_16 = arith.constant 0 : index
    %c0_17 = arith.constant 0 : index
    %21 = vector.load %arg2[%c0_16, %c0_17] : memref<1x512xi32, #tpu.memory_space<vmem>>, vector<1x512xi32>
    %22 = vector.broadcast %21 : vector<1x512xi32> to vector<64x512xi32>
    %23 = arith.cmpi eq, %3, %22 : vector<64x512xi32>
    %24 = arith.extui %23 : vector<64x512xi1> to vector<64x512xi32>
    %25 = arith.sitofp %24 : vector<64x512xi32> to vector<64x512xf32>
    %26 = arith.truncf %25 : vector<64x512xf32> to vector<64x512xbf16>
    %c0_18 = arith.constant 0 : index
    %c0_19 = arith.constant 0 : index
    %27 = vector.load %arg14[%c0_18, %c0_19] : memref<64x128xf32, #tpu.memory_space<vmem>>, vector<64x128xf32>
    %28 = arith.truncf %20 : vector<512x128xf32> to vector<512x128xbf16>
    %cst_20 = arith.constant dense<0.000000e+00> : vector<64x128xf32>
    %29 = tpu.matmul %26, %28, %cst_20 {dimension_numbers = #tpu.dot_dimension_numbers<[1], [0], [0], [1], [0, 0, 1, 1], [], []>} : vector<64x512xbf16>, vector<512x128xbf16>, vector<64x128xf32> -> vector<64x128xf32>
    %30 = arith.addf %27, %29 : vector<64x128xf32>
    %c0_21 = arith.constant 0 : index
    %c0_22 = arith.constant 0 : index
    %31 = vector.load %arg14[%c0_21, %c0_22] : memref<64x128xf32, #tpu.memory_space<vmem>>, vector<64x128xf32>
    tpu.vector_store %arg14[%c0_21, %c0_22], %30 {strides = array<i32>} : memref<64x128xf32, #tpu.memory_space<vmem>>, vector<64x128xf32>,
    %c1_i32 = arith.constant 1 : i32
    %32 = arith.cmpi eq, %arg0, %c1_i32 : i32
    %33 = arith.extui %32 : i1 to i32
    %c0_i32_23 = arith.constant 0 : i32
    %34 = arith.cmpi ne, %33, %c0_i32_23 : i32
    scf.if %34 {
      %c0_24 = arith.constant 0 : index
      %c0_25 = arith.constant 0 : index
      %35 = vector.load %arg5[%c0_24, %c0_25] : memref<64x32xbf16, #tpu.memory_space<vmem>>, vector<64x32xbf16>
      %c0_26 = arith.constant 0 : index
      %c0_27 = arith.constant 0 : index
      %36 = vector.load %arg9[%c0_26, %c0_27] : memref<1x32xbf16, #tpu.memory_space<vmem>>, vector<1x32xbf16>
      %37 = vector.broadcast %36 : vector<1x32xbf16> to vector<64x32xbf16>
      %38 = arith.mulf %35, %37 : vector<64x32xbf16>
      %c0_28 = arith.constant 0 : index
      %c0_29 = arith.constant 0 : index
      %39 = vector.load %arg8[%c0_28, %c0_29] : memref<32x128xbf16, #tpu.memory_space<vmem>>, vector<32x128xbf16>
      %cst_30 = arith.constant dense<0.000000e+00> : vector<64x128xf32>
      %40 = tpu.matmul %38, %39, %cst_30 {dimension_numbers = #tpu.dot_dimension_numbers<[1], [0], [0], [1], [0, 0, 1, 1], [], []>} : vector<64x32xbf16>, vector<32x128xbf16>, vector<64x128xf32> -> vector<64x128xf32>
      %c0_31 = arith.constant 0 : index
      %c0_32 = arith.constant 0 : index
      %41 = vector.load %arg14[%c0_31, %c0_32] : memref<64x128xf32, #tpu.memory_space<vmem>>, vector<64x128xf32>
      %42 = arith.addf %41, %40 : vector<64x128xf32>
      %43 = tpu.iota {dimensions = array<i32: 0>} : vector<64x1xi32>
      %c64_i32 = arith.constant 64 : i32
      %44 = vector.broadcast %c64_i32 : i32 to vector<64x1xi32>
      %45 = arith.cmpi slt, %43, %44 : vector<64x1xi32>
      %46 = arith.extui %45 : vector<64x1xi1> to vector<64x1xi32>
      %47 = arith.sitofp %46 : vector<64x1xi32> to vector<64x1xf32>
      %48 = vector.broadcast %47 : vector<64x1xf32> to vector<64x128xf32>
      %49 = arith.mulf %42, %48 : vector<64x128xf32>
      %cst_33 = arith.constant dense<0.000000e+00> : vector<128xf32>
      %50 = vector.multi_reduction <add>, %49, %cst_33 [0] : vector<64x128xf32> to vector<128xf32>
      %51 = vector.shape_cast %50 : vector<128xf32> to vector<1x128xf32>
      %cst_34 = arith.constant 1.562500e-02 : f32
      %52 = vector.broadcast %cst_34 : f32 to vector<1x128xf32>
      %53 = arith.mulf %51, %52 : vector<1x128xf32>
      %54 = vector.broadcast %53 : vector<1x128xf32> to vector<64x128xf32>
      %55 = arith.subf %42, %54 : vector<64x128xf32>
      %56 = vector.broadcast %47 : vector<64x1xf32> to vector<64x128xf32>
      %57 = arith.mulf %55, %56 : vector<64x128xf32>
      %58 = arith.mulf %57, %57 : vector<64x128xf32>
      %cst_35 = arith.constant dense<0.000000e+00> : vector<128xf32>
      %59 = vector.multi_reduction <add>, %58, %cst_35 [0] : vector<64x128xf32> to vector<128xf32>
      %60 = vector.shape_cast %59 : vector<128xf32> to vector<1x128xf32>
      %cst_36 = arith.constant 1.562500e-02 : f32
      %61 = vector.broadcast %cst_36 : f32 to vector<1x128xf32>
      %62 = arith.mulf %60, %61 : vector<1x128xf32>
      %63 = vector.broadcast %53 : vector<1x128xf32> to vector<64x128xf32>
      %64 = arith.subf %42, %63 : vector<64x128xf32>
      %cst_37 = arith.constant 9.99999974E-6 : f32
      %65 = vector.broadcast %cst_37 : f32 to vector<1x128xf32>
      %66 = arith.addf %62, %65 : vector<1x128xf32>
      %67 = math.rsqrt %66 : vector<1x128xf32>
      %68 = vector.broadcast %67 : vector<1x128xf32> to vector<64x128xf32>
      %69 = arith.mulf %64, %68 : vector<64x128xf32>
      %c0_38 = arith.constant 0 : index
      %c0_39 = arith.constant 0 : index
      %70 = vector.load %arg12[%c0_38, %c0_39] : memref<1x128xf32, #tpu.memory_space<vmem>>, vector<1x128xf32>
      %71 = vector.broadcast %70 : vector<1x128xf32> to vector<64x128xf32>
      %72 = arith.mulf %71, %69 : vector<64x128xf32>
      %c0_40 = arith.constant 0 : index
      %c0_41 = arith.constant 0 : index
      %73 = vector.load %arg13[%c0_40, %c0_41] : memref<1x128xf32, #tpu.memory_space<vmem>>, vector<1x128xf32>
      %74 = vector.broadcast %73 : vector<1x128xf32> to vector<64x128xf32>
      %75 = arith.addf %72, %74 : vector<64x128xf32>
      %c0_42 = arith.constant 0 : index
      %c0_43 = arith.constant 0 : index
      %76 = vector.load %arg14[%c0_42, %c0_43] : memref<64x128xf32, #tpu.memory_space<vmem>>, vector<64x128xf32>
      tpu.vector_store %arg14[%c0_42, %c0_43], %75 {strides = array<i32>} : memref<64x128xf32, #tpu.memory_space<vmem>>, vector<64x128xf32>,
      %c0_44 = arith.constant 0 : index
      %c0_45 = arith.constant 0 : index
      %77 = vector.load %arg10[%c0_44, %c0_45] : memref<16x32xbf16, #tpu.memory_space<vmem>>, vector<16x32xbf16>
      %c0_46 = arith.constant 0 : index
      %c0_47 = arith.constant 0 : index
      %78 = vector.load %arg11[%c0_46, %c0_47] : memref<32x128xbf16, #tpu.memory_space<vmem>>, vector<32x128xbf16>
      %cst_48 = arith.constant dense<0.000000e+00> : vector<16x128xf32>
      %79 = tpu.matmul %77, %78, %cst_48 {dimension_numbers = #tpu.dot_dimension_numbers<[1], [0], [0], [1], [0, 0, 1, 1], [], []>} : vector<16x32xbf16>, vector<32x128xbf16>, vector<16x128xf32> -> vector<16x128xf32>
      %c0_49 = arith.constant 0 : index
      %c0_50 = arith.constant 0 : index
      %80 = vector.load %arg15[%c0_49, %c0_50] : memref<16x128xf32, #tpu.memory_space<vmem>>, vector<16x128xf32>
      tpu.vector_store %arg15[%c0_49, %c0_50], %79 {strides = array<i32>} : memref<16x128xf32, #tpu.memory_space<vmem>>, vector<16x128xf32>,
    } else {
    }
    return
  }
  func.func @transform_0(%arg0: i32) -> (i32, i32) {
    %c0_i32 = arith.constant 0 : i32
    %c0_i32_0 = arith.constant 0 : i32
    return %c0_i32, %arg0 : i32, i32
  }
  func.func @transform_1(%arg0: i32) -> (i32, i32) {
    %c0_i32 = arith.constant 0 : i32
    %c0_i32_0 = arith.constant 0 : i32
    return %c0_i32, %arg0 : i32, i32
  }
  func.func @transform_2(%arg0: i32) -> (i32, i32) {
    %c0_i32 = arith.constant 0 : i32
    %c0_i32_0 = arith.constant 0 : i32
    return %arg0, %c0_i32 : i32, i32
  }
  func.func @transform_3(%arg0: i32) -> (i32, i32) {
    %c0_i32 = arith.constant 0 : i32
    %c0_i32_0 = arith.constant 0 : i32
    return %arg0, %c0_i32 : i32, i32
  }
  func.func @transform_4(%arg0: i32) -> (i32, i32) {
    %c0_i32 = arith.constant 0 : i32
    %c0_i32_0 = arith.constant 0 : i32
    %c0_i32_1 = arith.constant 0 : i32
    return %c0_i32, %c0_i32_0 : i32, i32
  }
  func.func @transform_5(%arg0: i32) -> (i32, i32) {
    %c0_i32 = arith.constant 0 : i32
    %c0_i32_0 = arith.constant 0 : i32
    %c0_i32_1 = arith.constant 0 : i32
    return %c0_i32, %c0_i32_0 : i32, i32
  }
  func.func @transform_6(%arg0: i32) -> (i32, i32) {
    %c0_i32 = arith.constant 0 : i32
    %c0_i32_0 = arith.constant 0 : i32
    %c0_i32_1 = arith.constant 0 : i32
    return %c0_i32, %c0_i32_0 : i32, i32
  }
  func.func @transform_7(%arg0: i32) -> (i32, i32) {
    %c0_i32 = arith.constant 0 : i32
    %c0_i32_0 = arith.constant 0 : i32
    %c0_i32_1 = arith.constant 0 : i32
    return %c0_i32, %c0_i32_0 : i32, i32
  }
  func.func @transform_8(%arg0: i32) -> (i32, i32) {
    %c0_i32 = arith.constant 0 : i32
    %c0_i32_0 = arith.constant 0 : i32
    %c0_i32_1 = arith.constant 0 : i32
    return %c0_i32, %c0_i32_0 : i32, i32
  }
  func.func @transform_9(%arg0: i32) -> (i32, i32) {
    %c0_i32 = arith.constant 0 : i32
    %c0_i32_0 = arith.constant 0 : i32
    %c0_i32_1 = arith.constant 0 : i32
    return %c0_i32, %c0_i32_0 : i32, i32
  }
  func.func @transform_10(%arg0: i32) -> (i32, i32) {
    %c0_i32 = arith.constant 0 : i32
    %c0_i32_0 = arith.constant 0 : i32
    %c0_i32_1 = arith.constant 0 : i32
    return %c0_i32, %c0_i32_0 : i32, i32
  }
  func.func @transform_11(%arg0: i32) -> (i32, i32) {
    %c0_i32 = arith.constant 0 : i32
    %c0_i32_0 = arith.constant 0 : i32
    %c0_i32_1 = arith.constant 0 : i32
    return %c0_i32, %c0_i32_0 : i32, i32
  }
  func.func @transform_12(%arg0: i32) -> (i32, i32) {
    %c0_i32 = arith.constant 0 : i32
    %c0_i32_0 = arith.constant 0 : i32
    %c0_i32_1 = arith.constant 0 : i32
    return %c0_i32, %c0_i32_0 : i32, i32
  }
  func.func @transform_13(%arg0: i32) -> (i32, i32) {
    %c0_i32 = arith.constant 0 : i32
    %c0_i32_0 = arith.constant 0 : i32
    %c0_i32_1 = arith.constant 0 : i32
    return %c0_i32, %c0_i32_0 : i32, i32
  }
  func.func @transform_14(%arg0: i32) -> (i32, i32) {
    %c0_i32 = arith.constant 0 : i32
    %c0_i32_0 = arith.constant 0 : i32
    %c0_i32_1 = arith.constant 0 : i32
    return %c0_i32, %c0_i32_0 : i32, i32
  }
}

</mosaic_0001>

<bundles_post_ra>
// kernel: tpu_custom_call.1
= control target key start
LH: loop header
LB: loop body
LE: loop exit
PB: predicated region body
PF: predicated region fallthrough
CT: control target
= control target key end

     0   :  { %20 = vsyncpa [#allocation3], 0  ;;  %s4470_s0 = inlined_call_operand.vmem [shape: s32[1,1024], index: 0, kind: input, shape index: {}]   ;;  %s4471_s1 = inlined_call_operand.vmem [shape: s32[1,1024], index: 1, kind: input, shape index: {}]   ;;  %s4472_s2 = inlined_call_operand.vmem [shape: bf16[1024,32], index: 2, kind: input, shape index: {}]   ;;  %s4473_s3 = inlined_call_operand.vmem [shape: bf16[1024,32], index: 3, kind: input, shape index: {}]   ;;  %s4474_s4 = inlined_call_operand.vmem [shape: bf16[64,32], index: 4, kind: input, shape index: {}]   ;;  %s4475_s5 = inlined_call_operand.vmem [shape: bf16[32,128], index: 5, kind: input, shape index: {}]   ;;  %s4476_s6 = inlined_call_operand.vmem [shape: bf16[32,128], index: 6, kind: input, shape index: {}]   ;;  %s4477_s7 = inlined_call_operand.vmem [shape: bf16[32,128], index: 7, kind: input, shape index: {}]   ;;  %s4478_s8 = inlined_call_operand.vmem [shape: bf16[1,32], index: 8, kind: input, shape index: {}]   ;;  %s4479_s9 = inlined_call_operand.vmem [shape: bf16[16,32], index: 9, kind: input, shape index: {}]   ;;  %s4480_s10 = inlined_call_operand.vmem [shape: bf16[32,128], index: 10, kind: input, shape index: {}]   ;;  %s4481_s11 = inlined_call_operand.vmem [shape: f32[1,128], index: 11, kind: input, shape index: {}]   ;;  %s4482_s12 = inlined_call_operand.vmem [shape: f32[1,128], index: 12, kind: input, shape index: {}]   ;;  %s4483_s13 = inlined_call_operand.hbm [shape: f32[64,128], index: 13, kind: output, shape index: {0}]   ;;  %s4484_s14 = inlined_call_operand.hbm [shape: f32[16,128], index: 14, kind: output, shape index: {1}]  }
   0x1   :  { %21 = vsyncpa [#allocation5], 0  ;;  %s3820_s29 = smov 0  }
   0x2 LB: > { %4488 = sst [smem:[#allocation8_spill]] %s3735_s29  ;;  %s3826_s30 = sadd.s32 4294967295, %s3735_s29   ;;  %s3735_s29 = sphi %s3820_s29, %s27_s29  }
   0x3   : > { %p2885_p0 = scmp.ge.s32.totalorder %s3735_s29, 1  ;;  %p439_p1 = scmp.lt.s32.totalorder %s3735_s29, 3 }
   0x5   : > { %p440_p2 = pnand %p2885_p0, %p439_p1 }
   0x6   : > { %s2886_s15 = sshll.u32 (!%p440_p2), %s3826_s30, 2  ;;  %s2888_s16 = sshll.u32 (!%p440_p2), %s3826_s30, 6 }
   0x7   : > { %443 = sbr.rel (%p440_p2) target bundleno = 1328 (0x530), region = 72  ;;  %p494_p3 = scmp.lt.s32.totalorder (!%p440_p2), %s2886_s15, 7 }
   0x8   : > { %p504_p4 = scmp.lt.s32.totalorder (!%p440_p2), %s2888_s16, 127  ;;  %p2892_p5 = scmp.ne.s32.totalorder (!%p440_p2), %s3826_s30, 0 }
   0xc   : > { %s4492_s15 = smov (!%p494_p3, %s2886_s15), 7  ;;  %s4494_s16 = smov (!%p504_p4, %s2888_s16), 127 }
   0xd   : > { %s496_s19 = scalar_lea.vmem %s4470_s0, %s4492_s15  ;;  %s501_s22 = scalar_lea.vmem %s4471_s1, %s4492_s15 }
   0xe   : > { %s2889_s23 = sshll.u32 %s4494_s16, 2  ;;  %519 = sbr.rel (%p2892_p5) target bundleno = 24 (0x18), region = 76 }
   0xf   : > { %s3845_s26 = scalar_lea.vmem %s4472_s2, %s2889_s23  ;;  %s3850_s29 = scalar_lea.vmem %s4473_s3, %s2889_s23 }
  0x13   : > { %v3737_v0 = vmov 0.0  }
  0x14   : > { %520 = vst [vmem:[#allocation2] sm:$0xff] %v3737_v0  ;;  %521 = vst [vmem:[#allocation2 + $0x8] sm:$0xff] %v3737_v0 }
  0x15   : > { %522 = vst [vmem:[#allocation2 + $0x10] sm:$0xff] %v3737_v0  ;;  %523 = vst [vmem:[#allocation2 + $0x18] sm:$0xff] %v3737_v0 }
  0x16   : > { %524 = vst [vmem:[#allocation2 + $0x20] sm:$0xff] %v3737_v0  ;;  %525 = vst [vmem:[#allocation2 + $0x28] sm:$0xff] %v3737_v0 }
  0x17   : > { %526 = vst [vmem:[#allocation2 + $0x30] sm:$0xff] %v3737_v0  ;;  %527 = vst [vmem:[#allocation2 + $0x38] sm:$0xff] %v3737_v0 }
  0x18 PF: > { %v3598_v1 = vld [vmem:[%s4475_s5 + $0x8] sm:$0xff]   ;;  %v3599_v2 = vld [vmem:[%s4475_s5] sm:$0xff]   ;;  %vm777_vm0 = vcmask 261120   ;;  %v3602_v5 = vld [vmem:[%s3845_s26 + $0x10] sm:$0xff]   ;;  %v528_v35 = vlaneseq  ;;  %v4486_v41 = vmov 1.0|1.0  }
  0x19   : > { %3414 = vmatprep.subr.bf16.mxu0 %v3598_v1  ;;  %v3600_v3 = vld [vmem:[%s3845_s26] sm:$0xff]   ;;  %v3601_v4 = vld [vmem:[%s3845_s26 + $0x8] sm:$0xff]   ;;  %v3603_v6 = vld [vmem:[%s3845_s26 + $0x18] sm:$0xff]   ;;  %p3153_p6 = scmp.ne.s32.totalorder %s3826_s30, 1 }
  0x1a   : > { %3415 = vmatpush3.bf16.msra.mxu0 %v3598_v1  ;;  %3418 = vmatprep.mubr.msk.bf16.mxu0 %vm777_vm0, %v3600_v3  ;;  %v3604_v7 = vld [vmem:[%s3845_s26 + $0x20] sm:$0xff]   ;;  %v3605_v8 = vld [vmem:[%s3845_s26 + $0x28] sm:$0xff]   ;;  %v3606_v9 = vld [vmem:[%s3845_s26 + $0x30] sm:$0xff]   ;;  %v3923_v36 = vshrl.u32 %v528_v35, 7 }
  0x1b   : > { %3416 = vmatprep.subr.bf16.mxu0 %v3599_v2  ;;  %v3607_v10 = vld [vmem:[%s3845_s26 + $0x38] sm:$0xff]   ;;  %v3608_v11 = vld [vmem:[%s3845_s26 + $0x40] sm:$0xff]   ;;  %v3609_v12 = vld [vmem:[%s3845_s26 + $0x48] sm:$0xff]  }
  0x1c   : > { %v3610_v13 = vld [vmem:[%s3845_s26 + $0x50] sm:$0xff]   ;;  %v3611_v14 = vld [vmem:[%s3845_s26 + $0x58] sm:$0xff]   ;;  %v3612_v15 = vld [vmem:[%s3845_s26 + $0x60] sm:$0xff]   ;;  %v1170_v37 = vsub.s32 1, %v3923_v36  ;;  %v3934_v39 = vadd.s32 8, %v3923_v36 }
  0x1d   : > { %v3613_v16 = vld [vmem:[%s3845_s26 + $0x68] sm:$0xff]   ;;  %v3614_v17 = vld [vmem:[%s3845_s26 + $0x70] sm:$0xff]   ;;  %v3615_v18 = vld [vmem:[%s3845_s26 + $0x78] sm:$0xff]  }
  0x1e   : > { %3417 = vmatpush3.bf16.msra.mxu0 %v3599_v2  ;;  %v3616_v19 = vld [vmem:[%s3845_s26 + $0x80] sm:$0xff]   ;;  %v3617_v20 = vld [vmem:[%s3845_s26 + $0x88] sm:$0xff]   ;;  %v3618_v21 = vld [vmem:[%s3845_s26 + $0x90] sm:$0xff]  }
  0x1f   : > { %v3619_v22 = vld [vmem:[%s3845_s26 + $0x98] sm:$0xff]   ;;  %v3620_v23 = vld [vmem:[%s3845_s26 + $0xa0] sm:$0xff]   ;;  %v3621_v24 = vld [vmem:[%s3845_s26 + $0xa8] sm:$0xff]  }
  0x20   : > { %v3622_v25 = vld [vmem:[%s3845_s26 + $0xb0] sm:$0xff]   ;;  %v3623_v26 = vld [vmem:[%s3845_s26 + $0xb8] sm:$0xff]   ;;  %v3624_v27 = vld [vmem:[%s3845_s26 + $0xc0] sm:$0xff]  }
  0x21   : > { %3419 = vmatmul.mubr.msk.bf16.vlgmr.msra.gmra.mxu0 %vm777_vm0, %v3601_v4  ;;  %v3625_v28 = vld [vmem:[%s3845_s26 + $0xc8] sm:$0xff]   ;;  %v3626_v29 = vld [vmem:[%s3845_s26 + $0xd0] sm:$0xff]   ;;  %v3627_v30 = vld [vmem:[%s3845_s26 + $0xd8] sm:$0xff]  }
  0x22   : > { %3422 = vmatprep.mubr.msk.bf16.mxu0 %vm777_vm0, %v3602_v5  ;;  %v3628_v31 = vld [vmem:[%s3845_s26 + $0xe0] sm:$0xff]   ;;  %v3629_v32 = vld [vmem:[%s3845_s26 + $0xe8] sm:$0xff]   ;;  %v3630_v33 = vld [vmem:[%s3845_s26 + $0xf0] sm:$0xff]  }
  0x23   : > { %v3631_v34 = vld [vmem:[%s3845_s26 + $0xf8] sm:$0xff]   ;;  %v3931_v38 = vld [vmem:[%s496_s19] sm:$0xf] }
  0x24   : > { %v3939_v40 = vrot.slane %v3931_v38, %v1170_v37 }
  0x26   : > { %vm1181_vm1 = vcmp.eq.s32.totalorder %v3923_v36, %v3939_v40  ;;  %vm1185_vm2 = vcmp.eq.s32.totalorder %v3934_v39, %v3939_v40 }
  0x27   : > { %vm2991_vm3 = vmpackc.low %vm1185_vm2, %vm1181_vm1 }
  0x28   : > { %2992 = vmatprep.mubr.msk.bf16.mxu1 %vm2991_vm3, %v4486_v41 }
  0x29   : > { %3423 = vmatmul.mubr.msk.bf16.gmra.mxu0 %vm777_vm0, %v3603_v6 }
  0x2a   : > { %3426 = vmatprep.mubr.msk.bf16.mxu0 %vm777_vm0, %v3604_v7 }
  0x31   : > { %3427 = vmatmul.mubr.msk.bf16.gmra.mxu0 %vm777_vm0, %v3605_v8 }
  0x32   : > { %3430 = vmatprep.mubr.msk.bf16.mxu0 %vm777_vm0, %v3606_v9 }
  0x39   : > { %3431 = vmatmul.mubr.msk.bf16.gmra.mxu0 %vm777_vm0, %v3607_v10 }
  0x3a   : > { %3434 = vmatprep.mubr.msk.bf16.mxu0 %vm777_vm0, %v3608_v11 }
  0x41   : > { %3435 = vmatmul.mubr.msk.bf16.gmra.mxu0 %vm777_vm0, %v3609_v12 }
  0x42   : > { %3438 = vmatprep.mubr.msk.bf16.mxu0 %vm777_vm0, %v3610_v13 }
  0x49   : > { %3439 = vmatmul.mubr.msk.bf16.gmra.mxu0 %vm777_vm0, %v3611_v14 }
  0x4a   : > { %3442 = vmatprep.mubr.msk.bf16.mxu0 %vm777_vm0, %v3612_v15 }
  0x51   : > { %3443 = vmatmul.mubr.msk.bf16.gmra.mxu0 %vm777_vm0, %v3613_v16 }
  0x52   : > { %3446 = vmatprep.mubr.msk.bf16.mxu0 %vm777_vm0, %v3614_v17 }
  0x59   : > { %3447 = vmatmul.mubr.msk.bf16.gmra.mxu0 %vm777_vm0, %v3615_v18 }
  0x5a   : > { %3450 = vmatprep.mubr.msk.bf16.mxu0 %vm777_vm0, %v3616_v19 }
  0x61   : > { %3451 = vmatmul.mubr.msk.bf16.gmra.mxu0 %vm777_vm0, %v3617_v20 }
  0x62   : > { %3454 = vmatprep.mubr.msk.bf16.mxu0 %vm777_vm0, %v3618_v21 }
  0x69   : > { %3455 = vmatmul.mubr.msk.bf16.gmra.mxu0 %vm777_vm0, %v3619_v22 }
  0x6a   : > { %3458 = vmatprep.mubr.msk.bf16.mxu0 %vm777_vm0, %v3620_v23 }
  0x71   : > { %3459 = vmatmul.mubr.msk.bf16.gmra.mxu0 %vm777_vm0, %v3621_v24 }
  0x72   : > { %3462 = vmatprep.mubr.msk.bf16.mxu0 %vm777_vm0, %v3622_v25 }
  0x79   : > { %3463 = vmatmul.mubr.msk.bf16.gmra.mxu0 %vm777_vm0, %v3623_v26 }
  0x7a   : > { %3466 = vmatprep.mubr.msk.bf16.mxu0 %vm777_vm0, %v3624_v27 }
  0x81   : > { %3467 = vmatmul.mubr.msk.bf16.gmra.mxu0 %vm777_vm0, %v3625_v28 }
  0x82   : > { %3470 = vmatprep.mubr.msk.bf16.mxu0 %vm777_vm0, %v3626_v29 }
  0x89   : > { %3471 = vmatmul.mubr.msk.bf16.gmra.mxu0 %vm777_vm0, %v3627_v30 }
  0x8a   : > { %3474 = vmatprep.mubr.msk.bf16.mxu0 %vm777_vm0, %v3628_v31 }
  0x91   : > { %3475 = vmatmul.mubr.msk.bf16.gmra.mxu0 %vm777_vm0, %v3629_v32 }
  0x92   : > { %3478 = vmatprep.mubr.msk.bf16.mxu0 %vm777_vm0, %v3630_v33 }
  0x99   : > { %3479 = vmatmul.mubr.msk.bf16.gmra.mxu0 %vm777_vm0, %v3631_v34 }
  0xe1   : > { %v3946_v42 = vpop.f32.mrf.mxu0 }
  0xe3   : > { %v3948_v43 = vpop.f32.mrf.mxu0 }
  0xe5   : > { %v3950_v44 = vpop.f32.mrf.mxu0 }
  0xe6   : > { %v1301_v45 = vpack.c.bf16 %v3950_v44, %v3946_v42  ;;  %v4024_v44 = vadd.s32 32, %v3923_v36 }
  0xe7   : > { %v3954_v46 = vpop.f32.mrf.mxu0 }
  0xe8   : > { %v1300_v47 = vpack.c.bf16 %v3954_v46, %v3948_v43  ;;  %vm1197_vm12 = vcmp.eq.s32.totalorder %v4024_v44, %v3939_v40 }
  0xe9   : > { %v3424_v48 = vpop.f32.mrf.mxu0 }
  0xeb   : > { %v3958_v49 = vpop.f32.mrf.mxu0 }
  0xed   : > { %v3425_v50 = vpop.f32.mrf.mxu0 }
  0xee   : > { %v1303_v51 = vpack.c.bf16 %v3425_v50, %v3424_v48 }
  0xef   : > { %v3960_v52 = vpop.f32.mrf.mxu0 }
  0xf0   : > { %v1302_v53 = vpack.c.bf16 %v3960_v52, %v3958_v49  ;;  %v3991_v49 = vsub.s32 0, %v3923_v36 }
  0xf1   : > { %v3428_v54 = vpop.f32.mrf.mxu0 }
  0xf3   : > { %v940_v55 = vpop.f32.mrf.mxu0 }
  0xf5   : > { %v3429_v56 = vpop.f32.mrf.mxu0 }
  0xf6   : > { %v1305_v23 = vpack.c.bf16 %v3429_v56, %v3428_v54 }
  0xf7   : > { %v943_v57 = vpop.f32.mrf.mxu0 }
  0xf8   : > { %v1304_v28 = vpack.c.bf16 %v943_v57, %v940_v55  ;;  %v1167_v55 = vrot.slane %v3931_v38, %v3991_v49  ;;  %v4002_v57 = vadd.s32 16, %v3923_v36 }
  0xf9   : > { %v3432_v58 = vpop.f32.mrf.mxu0 }
  0xfa   : > { %vm1180_vm4 = vcmp.eq.s32.totalorder %v3923_v36, %v1167_v55  ;;  %vm1184_vm5 = vcmp.eq.s32.totalorder %v3934_v39, %v1167_v55  ;;  %vm1189_vm6 = vcmp.eq.s32.totalorder %v4002_v57, %v3939_v40  ;;  %vm1188_vm10 = vcmp.eq.s32.totalorder %v4002_v57, %v1167_v55 }
  0xfb   : > { %v956_v59 = vpop.f32.mrf.mxu0  ;;  %vm2993_vm8 = vmpackc.low %vm1184_vm5, %vm1180_vm4  ;;  %vm1196_vm1 = vcmp.eq.s32.totalorder %v4024_v44, %v1167_v55 }
  0xfd   : > { %v3433_v60 = vpop.f32.mrf.mxu0 }
  0xfe   : > { %v1307_v14 = vpack.c.bf16 %v3433_v60, %v3432_v58 }
  0xff   : > { %v959_v61 = vpop.f32.mrf.mxu0 }
 0x100   : > { %v1306_v18 = vpack.c.bf16 %v959_v61, %v956_v59 }
 0x101   : > { %v3436_v62 = vpop.f32.mrf.mxu0 }
 0x103   : > { %v972_v63 = vpop.f32.mrf.mxu0 }
 0x105   : > { %v3437_v0 = vpop.f32.mrf.mxu0 }
 0x106   : > { %v1309_v52 = vpack.c.bf16 %v3437_v0, %v3436_v62  ;;  %v4044_v62 = vadd.s32 48, %v3923_v36 }
 0x107   : > { %v975_v1 = vpop.f32.mrf.mxu0 }
 0x108   : > { %v1308_v58 = vpack.c.bf16 %v975_v1, %v972_v63  ;;  %v4047_v63 = vadd.s32 56, %v3923_v36  ;;  %vm1205_vm3 = vcmp.eq.s32.totalorder %v4044_v62, %v3939_v40 }
 0x109   : > { %v3440_v2 = vpop.f32.mrf.mxu0 }
 0x10a   : > { %vm1209_vm4 = vcmp.eq.s32.totalorder %v4047_v63, %v3939_v40 }
 0x10b   : > { %v988_v3 = vpop.f32.mrf.mxu0 }
 0x10d   : > { %v3441_v4 = vpop.f32.mrf.mxu0 }
 0x10e   : > { %v1311_v30 = vpack.c.bf16 %v3441_v4, %v3440_v2  ;;  %v1178_v2 = vsub.s32 3, %v3923_v36 }
 0x10f   : > { %v991_v5 = vpop.f32.mrf.mxu0 }
 0x110   : > { %v1310_v34 = vpack.c.bf16 %v991_v5, %v988_v3  ;;  %v4061_v5 = vrot.slane %v3931_v38, %v1178_v2 }
 0x111   : > { %v3444_v6 = vpop.f32.mrf.mxu0 }
 0x113   : > { %v1004_v7 = vpop.f32.mrf.mxu0 }
 0x115   : > { %v3445_v8 = vpop.f32.mrf.mxu0 }
 0x116   : > { %v1313_v20 = vpack.c.bf16 %v3445_v8, %v3444_v6 }
 0x117   : > { %v1007_v9 = vpop.f32.mrf.mxu0 }
 0x118   : > { %v1312_v25 = vpack.c.bf16 %v1007_v9, %v1004_v7 }
 0x119   : > { %v3448_v10 = vpop.f32.mrf.mxu0 }
 0x11b   : > { %v1020_v11 = vpop.f32.mrf.mxu0 }
 0x11d   : > { %v3449_v12 = vpop.f32.mrf.mxu0 }
 0x11e   : > { %v1315_v13 = vpack.c.bf16 %v3449_v12, %v3448_v10 }
 0x11f   : > { %v1023_v15 = vpop.f32.mrf.mxu0 }
 0x120   : > { %v1314_v16 = vpack.c.bf16 %v1023_v15, %v1020_v11  ;;  %3211 = vmatprep.subr.bf16.mxu1 %v1315_v13 }
 0x121   : > { %v3964_v17 = vpop.f32.mrf.mxu0  ;;  %3212 = vmatpush3.bf16.msra.mxu1 %v1307_v14 }
 0x122   : > { %3213 = vmatprep.subr.bf16.mxu1 %v1314_v16 }
 0x123   : > { %v3966_v19 = vpop.f32.mrf.mxu0 }
 0x125   : > { %v3968_v21 = vpop.f32.mrf.mxu0  ;;  %3214 = vmatpush3.bf16.msra.mxu1 %v1306_v18 }
 0x126   : > { %v1317_v22 = vpack.c.bf16 %v3968_v21, %v3964_v17  ;;  %3215 = vmatprep.subr.bf16.mxu1 %v1313_v20  ;;  %v3634_v17 = vld [vmem:[%s3850_s29] sm:$0xff]   ;;  %v3636_v21 = vld [vmem:[%s3850_s29 + $0x10] sm:$0xff]  }
 0x127   : > { %v3972_v24 = vpop.f32.mrf.mxu0 }
 0x128   : > { %v1316_v26 = vpack.c.bf16 %v3972_v24, %v3966_v19  ;;  %v3635_v19 = vld [vmem:[%s3850_s29 + $0x8] sm:$0xff]   ;;  %v3638_v24 = vld [vmem:[%s3850_s29 + $0x20] sm:$0xff]  }
 0x129   : > { %v3976_v27 = vpop.f32.mrf.mxu0  ;;  %3216 = vmatpush3.bf16.msra.mxu1 %v1305_v23 }
 0x12a   : > { %3217 = vmatprep.subr.bf16.mxu1 %v1312_v25 }
 0x12b   : > { %v3978_v29 = vpop.f32.mrf.mxu0 }
 0x12d   : > { %v3980_v31 = vpop.f32.mrf.mxu0  ;;  %3218 = vmatpush3.bf16.msra.mxu1 %v1304_v28 }
 0x12e   : > { %v1319_v32 = vpack.c.bf16 %v3980_v31, %v3976_v27  ;;  %3219 = vmatprep.subr.bf16.mxu1 %v1311_v30  ;;  %v3632_v27 = vld [vmem:[%s4476_s6 + $0x8] sm:$0xff]   ;;  %v3641_v31 = vld [vmem:[%s3850_s29 + $0x38] sm:$0xff]  }
 0x12f   : > { %v3984_v33 = vpop.f32.mrf.mxu0 }
 0x130   : > { %v1318_v35 = vpack.c.bf16 %v3984_v33, %v3978_v29  ;;  %v3640_v29 = vld [vmem:[%s3850_s29 + $0x30] sm:$0xff]   ;;  %v3643_v33 = vld [vmem:[%s3850_s29 + $0x48] sm:$0xff]  }
 0x131   : > { %v3988_v48 = vpop.f32.mrf.mxu0  ;;  %3220 = vmatpush3.bf16.msra.mxu1 %v1303_v51  ;;  %v4005_v51 = vadd.s32 24, %v3923_v36 }
 0x132   : > { %3221 = vmatprep.subr.bf16.mxu1 %v1310_v34  ;;  %v1174_v34 = vsub.s32 2, %v3923_v36 }
 0x133   : > { %v3993_v50 = vpop.f32.mrf.mxu0  ;;  %vm1193_vm7 = vcmp.eq.s32.totalorder %v4005_v51, %v3939_v40  ;;  %vm1192_vm11 = vcmp.eq.s32.totalorder %v4005_v51, %v1167_v55 }
 0x134   : > { %vm2995_vm9 = vmpackc.low %vm1193_vm7, %vm1189_vm6  ;;  %vm1204_vm7 = vcmp.eq.s32.totalorder %v4044_v62, %v1167_v55 }
 0x135   : > { %v3995_v54 = vpop.f32.mrf.mxu0  ;;  %3222 = vmatpush3.bf16.msra.mxu1 %v1302_v53  ;;  %vm2997_vm14 = vmpackc.low %vm1192_vm11, %vm1188_vm10  ;;  %vm1187_vm10 = vcmp.eq.s32.totalorder %v3934_v39, %v4061_v5 }
 0x136   : > { %3223 = vmatprep.subr.bf16.mxu1 %v1309_v52  ;;  %vm3003_vm6 = vmpackc.low %vm1209_vm4, %vm1205_vm3  ;;  %v1321_v20 = vpack.c.bf16 %v3995_v54, %v3988_v48  ;;  %v1175_v48 = vrot.slane %v3931_v38, %v1174_v34  ;;  %v3633_v38 = vld [vmem:[%s4476_s6] sm:$0xff]   ;;  %v3645_v54 = vld [vmem:[%s3850_s29 + $0x58] sm:$0xff]  }
 0x137   : > { %v3999_v56 = vpop.f32.mrf.mxu0 }
 0x138   : > { %v1320_v25 = vpack.c.bf16 %v3999_v56, %v3993_v50  ;;  %vm1190_vm4 = vcmp.eq.s32.totalorder %v4002_v57, %v1175_v48  ;;  %v3647_v56 = vld [vmem:[%s3850_s29 + $0x68] sm:$0xff]  }
 0x139   : > { %v4007_v59 = vpop.f32.mrf.mxu0  ;;  %3224 = vmatpush3.bf16.msra.mxu1 %v1301_v45  ;;  %v4027_v45 = vadd.s32 40, %v3923_v36 }
 0x13a   : > { %3225 = vmatprep.subr.bf16.mxu1 %v1308_v58  ;;  %v3648_v58 = vld [vmem:[%s3850_s29 + $0x70] sm:$0xff]  }
 0x13b   : > { %v4014_v53 = vpop.f32.mrf.mxu0  ;;  %vm1201_vm13 = vcmp.eq.s32.totalorder %v4027_v45, %v3939_v40  ;;  %vm1200_vm2 = vcmp.eq.s32.totalorder %v4027_v45, %v1167_v55 }
 0x13c   : > { %vm2999_vm15 = vmpackc.low %vm1201_vm13, %vm1197_vm12  ;;  %vm1182_vm13 = vcmp.eq.s32.totalorder %v3923_v36, %v1175_v48 }
 0x13d   : > { %v3465_v60 = vpop.f32.mrf.mxu0  ;;  %3226 = vmatpush3.bf16.msra.mxu1 %v1300_v47  ;;  %vm3001_vm5 = vmpackc.low %vm1200_vm2, %vm1196_vm1  ;;  %vm1195_vm1 = vcmp.eq.s32.totalorder %v4005_v51, %v4061_v5 }
 0x13e   : > { %v1323_v13 = vpack.c.bf16 %v3465_v60, %v4007_v59  ;;  %v3649_v59 = vld [vmem:[%s3850_s29 + $0x78] sm:$0xff]   ;;  %v3651_v60 = vld [vmem:[%s3850_s29 + $0x88] sm:$0xff]  }
 0x13f   : > { %v1087_v42 = vpop.f32.mrf.mxu0 }
 0x140   : > { %2994 = vmatmul.mubr.msk.bf16.vlgmr.msra.gmra.mxu1 %vm2993_vm8, %v4486_v41  ;;  %vm1208_vm8 = vcmp.eq.s32.totalorder %v4047_v63, %v1167_v55  ;;  %v1322_v16 = vpack.c.bf16 %v1087_v42, %v4014_v53  ;;  %v3646_v55 = vld [vmem:[%s3850_s29 + $0x60] sm:$0xff]   ;;  %v3652_v42 = vld [vmem:[%s3850_s29 + $0x90] sm:$0xff]  }
 0x141   : > { %v4030_v61 = vpop.f32.mrf.mxu0  ;;  %2996 = vmatprep.mubr.msk.bf16.mxu1 %vm2995_vm9, %v4486_v41  ;;  %vm1183_vm9 = vcmp.eq.s32.totalorder %v3923_v36, %v4061_v5  ;;  %vm3005_vm11 = vmpackc.low %vm1208_vm8, %vm1204_vm7  ;;  %vm1203_vm7 = vcmp.eq.s32.totalorder %v4027_v45, %v4061_v5  ;;  %v3650_v53 = vld [vmem:[%s3850_s29 + $0x80] sm:$0xff]  }
 0x142   : > { %vm3007_vm12 = vmpackc.low %vm1187_vm10, %vm1183_vm9  ;;  %vm1198_vm10 = vcmp.eq.s32.totalorder %v4024_v44, %v1175_v48 }
 0x143   : > { %v4035_v43 = vpop.f32.mrf.mxu0 }
 0x145   : > { %v3469_v46 = vpop.f32.mrf.mxu0 }
 0x146   : > { %v1325_v52 = vpack.c.bf16 %v3469_v46, %v4030_v61  ;;  %v3653_v61 = vld [vmem:[%s3850_s29 + $0x98] sm:$0xff]   ;;  %v3655_v46 = vld [vmem:[%s3850_s29 + $0xa8] sm:$0xff]  }
 0x147   : > { %v4041_v47 = vpop.f32.mrf.mxu0 }
 0x148   : > { %2998 = vmatmul.mubr.msk.bf16.gmra.mxu1 %vm2997_vm14, %v4486_v41  ;;  %v1324_v50 = vpack.c.bf16 %v4041_v47, %v4035_v43  ;;  %vm1186_vm14 = vcmp.eq.s32.totalorder %v3934_v39, %v1175_v48  ;;  %v3654_v43 = vld [vmem:[%s3850_s29 + $0xa0] sm:$0xff]   ;;  %v3656_v47 = vld [vmem:[%s3850_s29 + $0xb0] sm:$0xff]  }
 0x149   : > { %v3472_v0 = vpop.f32.mrf.mxu0  ;;  %3000 = vmatprep.mubr.msk.bf16.mxu1 %vm2999_vm15, %v4486_v41  ;;  %vm1191_vm15 = vcmp.eq.s32.totalorder %v4002_v57, %v4061_v5  ;;  %vm3009_vm2 = vmpackc.low %vm1186_vm14, %vm1182_vm13  ;;  %vm1211_vm13 = vcmp.eq.s32.totalorder %v4047_v63, %v4061_v5 }
 0x14a   : > { %vm3011_vm3 = vmpackc.low %vm1195_vm1, %vm1191_vm15  ;;  %vm1206_vm1 = vcmp.eq.s32.totalorder %v4044_v62, %v1175_v48 }
 0x14b   : > { %v1116_v1 = vpop.f32.mrf.mxu0 }
 0x14d   : > { %v3473_v3 = vpop.f32.mrf.mxu0 }
 0x14e   : > { %v1327_v28 = vpack.c.bf16 %v3473_v3, %v3472_v0  ;;  %v3657_v0 = vld [vmem:[%s3850_s29 + $0xb8] sm:$0xff]   ;;  %v3659_v3 = vld [vmem:[%s3850_s29 + $0xc8] sm:$0xff]  }
 0x14f   : > { %v1119_v4 = vpop.f32.mrf.mxu0 }
 0x150   : > { %3002 = vmatmul.mubr.msk.bf16.gmra.mxu1 %vm3001_vm5, %v4486_v41  ;;  %v1326_v30 = vpack.c.bf16 %v1119_v4, %v1116_v1  ;;  %vm1194_vm5 = vcmp.eq.s32.totalorder %v4005_v51, %v1175_v48  ;;  %v3658_v1 = vld [vmem:[%s3850_s29 + $0xc0] sm:$0xff]   ;;  %v3660_v4 = vld [vmem:[%s3850_s29 + $0xd0] sm:$0xff]  }
 0x151   : > { %v3476_v6 = vpop.f32.mrf.mxu0  ;;  %3004 = vmatprep.mubr.msk.bf16.mxu1 %vm3003_vm6, %v4486_v41  ;;  %vm1199_vm6 = vcmp.eq.s32.totalorder %v4024_v44, %v4061_v5  ;;  %vm3013_vm8 = vmpackc.low %vm1194_vm5, %vm1190_vm4 }
 0x152   : > { %vm3015_vm9 = vmpackc.low %vm1203_vm7, %vm1199_vm6 }
 0x153   : > { %v1132_v40 = vpop.f32.mrf.mxu0 }
 0x155   : > { %v3477_v7 = vpop.f32.mrf.mxu0 }
 0x156   : > { %v1329_v18 = vpack.c.bf16 %v3477_v7, %v3476_v6  ;;  %v3661_v7 = vld [vmem:[%s3850_s29 + $0xd8] sm:$0xff]  }
 0x157   : > { %v1135_v8 = vpop.f32.mrf.mxu0 }
 0x158   : > { %3006 = vmatmul.mubr.msk.bf16.gmra.mxu1 %vm3005_vm11, %v4486_v41  ;;  %v1328_v23 = vpack.c.bf16 %v1135_v8, %v1132_v40  ;;  %vm1202_vm11 = vcmp.eq.s32.totalorder %v4027_v45, %v1175_v48 }
 0x159   : > { %v3480_v9 = vpop.f32.mrf.mxu0  ;;  %3008 = vmatprep.mubr.msk.bf16.mxu1 %vm3007_vm12, %v4486_v41  ;;  %vm1207_vm12 = vcmp.eq.s32.totalorder %v4044_v62, %v4061_v5  ;;  %vm3017_vm14 = vmpackc.low %vm1202_vm11, %vm1198_vm10 }
 0x15a   : > { %vm3019_vm15 = vmpackc.low %vm1211_vm13, %vm1207_vm12 }
 0x15b   : > { %v1148_v10 = vpop.f32.mrf.mxu0 }
 0x15d   : > { %v3481_v11 = vpop.f32.mrf.mxu0 }
 0x15e   : > { %v1331_v12 = vpack.c.bf16 %v3481_v11, %v3480_v9  ;;  %v3662_v9 = vld [vmem:[%s3850_s29 + $0xe0] sm:$0xff]  }
 0x15f   : > { %v1151_v14 = vpop.f32.mrf.mxu0 }
 0x160   : > { %v1330_v15 = vpack.c.bf16 %v1151_v14, %v1148_v10  ;;  %3251 = vmatprep.subr.bf16.mxu1 %v1331_v12 }
 0x161   : > { %3252 = vmatpush3.bf16.msra.mxu1 %v1323_v13 }
 0x162   : > { %3253 = vmatprep.subr.bf16.mxu1 %v1330_v15  ;;  %v3663_v15 = vld [vmem:[%s3850_s29 + $0xe8] sm:$0xff]  }
 0x165   : > { %3254 = vmatpush3.bf16.msra.mxu1 %v1322_v16 }
 0x166   : > { %3255 = vmatprep.subr.bf16.mxu1 %v1329_v18  ;;  %v3664_v18 = vld [vmem:[%s3850_s29 + $0xf0] sm:$0xff]  }
 0x169   : > { %3256 = vmatpush3.bf16.msra.mxu1 %v1321_v20 }
 0x16a   : > { %3257 = vmatprep.subr.bf16.mxu1 %v1328_v23 }
 0x16d   : > { %3258 = vmatpush3.bf16.msra.mxu1 %v1320_v25 }
 0x16e   : > { %3259 = vmatprep.subr.bf16.mxu1 %v1327_v28 }
 0x171   : > { %3260 = vmatpush3.bf16.msra.mxu1 %v1319_v32  ;;  %v3642_v32 = vld [vmem:[%s3850_s29 + $0x40] sm:$0xff]  }
 0x172   : > { %3261 = vmatprep.subr.bf16.mxu1 %v1326_v30 }
 0x175   : > { %3262 = vmatpush3.bf16.msra.mxu1 %v1318_v35  ;;  %v3644_v35 = vld [vmem:[%s3850_s29 + $0x50] sm:$0xff]  }
 0x176   : > { %3263 = vmatprep.subr.bf16.mxu1 %v1325_v52  ;;  %v3665_v52 = vld [vmem:[%s3850_s29 + $0xf8] sm:$0xff]  }
 0x179   : > { %3264 = vmatpush3.bf16.msra.mxu1 %v1317_v22  ;;  %v3637_v22 = vld [vmem:[%s3850_s29 + $0x18] sm:$0xff]  }
 0x17a   : > { %3265 = vmatprep.subr.bf16.mxu1 %v1324_v50 }
 0x17d   : > { %3266 = vmatpush3.bf16.msra.mxu1 %v1316_v26  ;;  %v3639_v26 = vld [vmem:[%s3850_s29 + $0x28] sm:$0xff]  }
 0x17e   : > { %3482 = vmatprep.subr.bf16.mxu1 %v3632_v27 }
 0x180   : > { %3010 = vmatmul.mubr.msk.bf16.vlgmr.msra.gmra.mxu1 %vm3009_vm2, %v4486_v41  ;;  %vm1210_vm2 = vcmp.eq.s32.totalorder %v4047_v63, %v1175_v48 }
 0x181   : > { %3012 = vmatprep.mubr.msk.bf16.mxu1 %vm3011_vm3, %v4486_v41  ;;  %3483 = vmatpush3.bf16.msra.mxu1 %v3632_v27  ;;  %vm3021_vm3 = vmpackc.low %vm1210_vm2, %vm1206_vm1 }
 0x182   : > { %3484 = vmatprep.subr.bf16.mxu1 %v3633_v38 }
 0x185   : > { %3485 = vmatpush3.bf16.msra.mxu1 %v3633_v38 }
 0x188   : > { %3014 = vmatmul.mubr.msk.bf16.gmra.mxu1 %vm3013_vm8, %v4486_v41 }
 0x189   : > { %3016 = vmatprep.mubr.msk.bf16.mxu1 %vm3015_vm9, %v4486_v41 }
 0x190   : > { %3018 = vmatmul.mubr.msk.bf16.gmra.mxu1 %vm3017_vm14, %v4486_v41 }
 0x191   : > { %3020 = vmatprep.mubr.msk.bf16.mxu1 %vm3019_vm15, %v4486_v41 }
 0x198   : > { %3022 = vmatmul.mubr.msk.bf16.gmra.mxu1 %vm3021_vm3, %v4486_v41 }
 0x199   : > { %3486 = vmatprep.mubr.msk.bf16.mxu1 %vm777_vm0, %v3634_v17 }
 0x1a0   : > { %3487 = vmatmul.mubr.msk.bf16.vlgmr.msra.gmra.mxu1 %vm777_vm0, %v3635_v19 }
 0x1a1   : > { %3490 = vmatprep.mubr.msk.bf16.mxu1 %vm777_vm0, %v3636_v21 }
 0x1a8   : > { %3491 = vmatmul.mubr.msk.bf16.gmra.mxu1 %vm777_vm0, %v3637_v22 }
 0x1a9   : > { %3494 = vmatprep.mubr.msk.bf16.mxu1 %vm777_vm0, %v3638_v24 }
 0x1b0   : > { %3495 = vmatmul.mubr.msk.bf16.gmra.mxu1 %vm777_vm0, %v3639_v26 }
 0x1b1   : > { %3498 = vmatprep.mubr.msk.bf16.mxu1 %vm777_vm0, %v3640_v29 }
 0x1b8   : > { %3499 = vmatmul.mubr.msk.bf16.gmra.mxu1 %vm777_vm0, %v3641_v31 }
 0x1b9   : > { %3502 = vmatprep.mubr.msk.bf16.mxu1 %vm777_vm0, %v3642_v32 }
 0x1c0   : > { %3503 = vmatmul.mubr.msk.bf16.gmra.mxu1 %vm777_vm0, %v3643_v33 }
 0x1c1   : > { %3506 = vmatprep.mubr.msk.bf16.mxu1 %vm777_vm0, %v3644_v35 }
 0x1c8   : > { %3507 = vmatmul.mubr.msk.bf16.gmra.mxu1 %vm777_vm0, %v3645_v54 }
 0x1c9   : > { %3510 = vmatprep.mubr.msk.bf16.mxu1 %vm777_vm0, %v3646_v55 }
 0x1d0   : > { %3511 = vmatmul.mubr.msk.bf16.gmra.mxu1 %vm777_vm0, %v3647_v56 }
 0x1d1   : > { %3514 = vmatprep.mubr.msk.bf16.mxu1 %vm777_vm0, %v3648_v58 }
 0x1d8   : > { %3515 = vmatmul.mubr.msk.bf16.gmra.mxu1 %vm777_vm0, %v3649_v59 }
 0x1d9   : > { %3518 = vmatprep.mubr.msk.bf16.mxu1 %vm777_vm0, %v3650_v53 }
 0x1e0   : > { %3519 = vmatmul.mubr.msk.bf16.gmra.mxu1 %vm777_vm0, %v3651_v60 }
 0x1e1   : > { %3522 = vmatprep.mubr.msk.bf16.mxu1 %vm777_vm0, %v3652_v42 }
 0x1e8   : > { %3523 = vmatmul.mubr.msk.bf16.gmra.mxu1 %vm777_vm0, %v3653_v61 }
 0x1e9   : > { %3526 = vmatprep.mubr.msk.bf16.mxu1 %vm777_vm0, %v3654_v43 }
 0x1f0   : > { %3527 = vmatmul.mubr.msk.bf16.gmra.mxu1 %vm777_vm0, %v3655_v46  ;;  %v4206_v46 = vld [vmem:[%s501_s22] sm:$0xf] }
 0x1f1   : > { %3530 = vmatprep.mubr.msk.bf16.mxu1 %vm777_vm0, %v3656_v47 }
 0x1f8   : > { %3531 = vmatmul.mubr.msk.bf16.gmra.mxu1 %vm777_vm0, %v3657_v0 }
 0x1f9   : > { %3534 = vmatprep.mubr.msk.bf16.mxu1 %vm777_vm0, %v3658_v1 }
 0x200   : > { %3535 = vmatmul.mubr.msk.bf16.gmra.mxu1 %vm777_vm0, %v3659_v3  ;;  %v3227_v5 = vpop.f32.mrf.mxu1 }
 0x201   : > { %3538 = vmatprep.mubr.msk.bf16.mxu1 %vm777_vm0, %v3660_v4  ;;  %v4213_v4 = vrot.slane %v4206_v46, %v1170_v37 }
 0x202   : > { %v3228_v6 = vpop.f32.mrf.mxu1 }
 0x203   : > { %v3229_v40 = vadd.f32 %v3228_v6, %v3227_v5  ;;  %vm2121_vm4 = vcmp.eq.s32.totalorder %v3923_v36, %v4213_v4  ;;  %vm2125_vm5 = vcmp.eq.s32.totalorder %v3934_v39, %v4213_v4  ;;  %vm2129_vm9 = vcmp.eq.s32.totalorder %v4002_v57, %v4213_v4 }
 0x204   : > { %v3230_v8 = vpop.f32.mrf.mxu1  ;;  %vm3121_vm6 = vmpackc.low %vm2125_vm5, %vm2121_vm4  ;;  %vm2133_vm10 = vcmp.eq.s32.totalorder %v4005_v51, %v4213_v4  ;;  %vm2137_vm15 = vcmp.eq.s32.totalorder %v4024_v44, %v4213_v4  ;;  %vm2141_vm1 = vcmp.eq.s32.totalorder %v4027_v45, %v4213_v4 }
 0x205   : > { %3122 = vmatprep.mubr.msk.bf16.mxu0 %vm3121_vm6, %v4486_v41  ;;  %vm3125_vm12 = vmpackc.low %vm2133_vm10, %vm2129_vm9  ;;  %vm2145_vm6 = vcmp.eq.s32.totalorder %v4044_v62, %v4213_v4 }
 0x206   : > { %v3231_v10 = vpop.f32.mrf.mxu1  ;;  %vm3129_vm3 = vmpackc.low %vm2141_vm1, %vm2137_vm15 }
 0x207   : > { %v3232_v11 = vadd.f32 %v3231_v10, %v3230_v8 }
 0x208   : > { %3539 = vmatmul.mubr.msk.bf16.gmra.mxu1 %vm777_vm0, %v3661_v7  ;;  %v3233_v12 = vpop.f32.mrf.mxu1 }
 0x209   : > { %3542 = vmatprep.mubr.msk.bf16.mxu1 %vm777_vm0, %v3662_v9 }
 0x20a   : > { %v3234_v13 = vpop.f32.mrf.mxu1 }
 0x20b   : > { %v3235_v14 = vadd.f32 %v3234_v13, %v3233_v12 }
 0x20c   : > { %v3236_v16 = vpop.f32.mrf.mxu1 }
 0x20e   : > { %v3237_v20 = vpop.f32.mrf.mxu1 }
 0x20f   : > { %v3238_v23 = vadd.f32 %v3237_v20, %v3236_v16 }
 0x210   : > { %3543 = vmatmul.mubr.msk.bf16.gmra.mxu1 %vm777_vm0, %v3663_v15  ;;  %v3239_v25 = vpop.f32.mrf.mxu1 }
 0x211   : > { %3546 = vmatprep.mubr.msk.bf16.mxu1 %vm777_vm0, %v3664_v18 }
 0x212   : > { %v3240_v28 = vpop.f32.mrf.mxu1 }
 0x213   : > { %v3241_v30 = vadd.f32 %v3240_v28, %v3239_v25 }
 0x214   : > { %v3242_v48 = vpop.f32.mrf.mxu1 }
 0x216   : > { %v3243_v50 = vpop.f32.mrf.mxu1 }
 0x217   : > { %v3244_v27 = vadd.f32 %v3243_v50, %v3242_v48 }
 0x218   : > { %3547 = vmatmul.mubr.msk.bf16.gmra.mxu1 %vm777_vm0, %v3665_v52  ;;  %v3245_v38 = vpop.f32.mrf.mxu1 }
 0x21a   : > { %v3246_v17 = vpop.f32.mrf.mxu1 }
 0x21b   : > { %v3247_v19 = vadd.f32 %v3246_v17, %v3245_v38 }
 0x21c   : > { %v3248_v21 = vpop.f32.mrf.mxu1 }
 0x21e   : > { %v3249_v22 = vpop.f32.mrf.mxu1 }
 0x21f   : > { %v3250_v24 = vadd.f32 %v3249_v22, %v3248_v21 }
 0x240   : > { %v3267_v26 = vpop.f32.mrf.mxu1 }
 0x242   : > { %v3268_v29 = vpop.f32.mrf.mxu1 }
 0x243   : > { %v3269_v31 = vadd.f32 %v3268_v29, %v3267_v26 }
 0x244   : > { %v3270_v32 = vpop.f32.mrf.mxu1 }
 0x245   : > { %v4195_v33 = vadd.f32 %v3269_v31, %v3229_v40 }
 0x246   : > { %v3271_v35 = vpop.f32.mrf.mxu1 }
 0x247   : > { %v3272_v54 = vadd.f32 %v3271_v35, %v3270_v32 }
 0x248   : > { %v3273_v55 = vpop.f32.mrf.mxu1 }
 0x249   : > { %v4197_v56 = vadd.f32 %v3272_v54, %v3232_v11 }
 0x24a   : > { %v3274_v58 = vpop.f32.mrf.mxu1 }
 0x24b   : > { %v3275_v59 = vadd.f32 %v3274_v58, %v3273_v55 }
 0x24c   : > { %v3276_v53 = vpop.f32.mrf.mxu1 }
 0x24d   : > { %v4199_v60 = vadd.f32 %v3275_v59, %v3235_v14 }
 0x24e   : > { %v3277_v42 = vpop.f32.mrf.mxu1 }
 0x24f   : > { %v3278_v61 = vadd.f32 %v3277_v42, %v3276_v53 }
 0x250   : > { %v3279_v43 = vpop.f32.mrf.mxu1 }
 0x251   : > { %v4208_v47 = vadd.f32 %v3278_v61, %v3238_v23 }
 0x252   : > { %v3280_v0 = vpop.f32.mrf.mxu1 }
 0x253   : > { %v3281_v1 = vadd.f32 %v3280_v0, %v3279_v43 }
 0x254   : > { %v3282_v3 = vpop.f32.mrf.mxu1 }
 0x255   : > { %v4215_v5 = vadd.f32 %v3281_v1, %v3241_v30 }
 0x256   : > { %v3283_v6 = vpop.f32.mrf.mxu1 }
 0x257   : > { %v3284_v40 = vadd.f32 %v3283_v6, %v3282_v3 }
 0x258   : > { %v3285_v7 = vpop.f32.mrf.mxu1 }
 0x259   : > { %v4222_v8 = vadd.f32 %v3284_v40, %v3244_v27 }
 0x25a   : > { %v3286_v9 = vpop.f32.mrf.mxu1 }
 0x25b   : > { %v3287_v10 = vadd.f32 %v3286_v9, %v3285_v7 }
 0x25c   : > { %v3288_v37 = vpop.f32.mrf.mxu1 }
 0x25d   : > { %v4224_v11 = vadd.f32 %v3287_v10, %v3247_v19 }
 0x25e   : > { %v3289_v12 = vpop.f32.mrf.mxu1 }
 0x25f   : > { %v3290_v13 = vadd.f32 %v3289_v12, %v3288_v37 }
 0x260   : > { %v4226_v14 = vpop.f32.mrf.mxu1 }
 0x261   : > { %v4228_v15 = vadd.f32 %v3290_v13, %v3250_v24 }
 0x262   : > { %v4230_v16 = vpop.f32.mrf.mxu1 }
 0x264   : > { %v4232_v18 = vpop.f32.mrf.mxu1 }
 0x265   : > { %v2241_v20 = vpack.c.bf16 %v4232_v18, %v4226_v14 }
 0x266   : > { %v4236_v23 = vpop.f32.mrf.mxu1 }
 0x267   : > { %v2240_v25 = vpack.c.bf16 %v4236_v23, %v4230_v16 }
 0x268   : > { %v3492_v28 = vpop.f32.mrf.mxu1 }
 0x26a   : > { %v4240_v30 = vpop.f32.mrf.mxu1 }
 0x26c   : > { %v3493_v52 = vpop.f32.mrf.mxu1 }
 0x26d   : > { %v2243_v48 = vpack.c.bf16 %v3493_v52, %v3492_v28 }
 0x26e   : > { %v4242_v50 = vpop.f32.mrf.mxu1 }
 0x26f   : > { %v2242_v27 = vpack.c.bf16 %v4242_v50, %v4240_v30 }
 0x270   : > { %v3496_v38 = vpop.f32.mrf.mxu1 }
 0x272   : > { %v1880_v17 = vpop.f32.mrf.mxu1 }
 0x274   : > { %v3497_v19 = vpop.f32.mrf.mxu1 }
 0x275   : > { %v2245_v50 = vpack.c.bf16 %v3497_v19, %v3496_v38 }
 0x276   : > { %v1883_v21 = vpop.f32.mrf.mxu1 }
 0x278   : > { %v3500_v22 = vpop.f32.mrf.mxu1 }
 0x27a   : > { %v1896_v24 = vpop.f32.mrf.mxu1 }
 0x27c   : > { %v3501_v26 = vpop.f32.mrf.mxu1 }
 0x27d   : > { %v2247_v7 = vpack.c.bf16 %v3501_v26, %v3500_v22 }
 0x27e   : > { %v1899_v29 = vpop.f32.mrf.mxu1 }
 0x27f   : > { %v2246_v12 = vpack.c.bf16 %v1899_v29, %v1896_v24  ;;  %v2244_v24 = vpack.c.bf16 %v1883_v21, %v1880_v17 }
 0x280   : > { %v3504_v31 = vpop.f32.mrf.mxu1 }
 0x282   : > { %v1912_v32 = vpop.f32.mrf.mxu1 }
 0x284   : > { %v3505_v35 = vpop.f32.mrf.mxu1 }
 0x285   : > { %v2249_v21 = vpack.c.bf16 %v3505_v35, %v3504_v31 }
 0x286   : > { %v1915_v54 = vpop.f32.mrf.mxu1 }
 0x288   : > { %v3508_v55 = vpop.f32.mrf.mxu1 }
 0x28a   : > { %v1928_v58 = vpop.f32.mrf.mxu1 }
 0x28c   : > { %v3509_v59 = vpop.f32.mrf.mxu1 }
 0x28e   : > { %v1931_v53 = vpop.f32.mrf.mxu1 }
 0x290   : > { %v3512_v42 = vpop.f32.mrf.mxu1 }
 0x292   : > { %v1944_v61 = vpop.f32.mrf.mxu1 }
 0x294   : > { %v3513_v43 = vpop.f32.mrf.mxu1 }
 0x295   : > { %v2253_v28 = vpack.c.bf16 %v3513_v43, %v3512_v42  ;;  %v2251_v42 = vpack.c.bf16 %v3509_v59, %v3508_v55  ;;  %v2107_v59 = vrot.slane %v4206_v46, %v3991_v49 }
 0x296   : > { %v1947_v0 = vpop.f32.mrf.mxu1 }
 0x297   : > { %v2252_v26 = vpack.c.bf16 %v1947_v0, %v1944_v61  ;;  %v2250_v61 = vpack.c.bf16 %v1931_v53, %v1928_v58  ;;  %v2248_v58 = vpack.c.bf16 %v1915_v54, %v1912_v32  ;;  %vm2120_vm7 = vcmp.eq.s32.totalorder %v3923_v36, %v2107_v59 }
 0x298   : > { %v3516_v1 = vpop.f32.mrf.mxu1  ;;  %vm2124_vm8 = vcmp.eq.s32.totalorder %v3934_v39, %v2107_v59  ;;  %vm2128_vm13 = vcmp.eq.s32.totalorder %v4002_v57, %v2107_v59  ;;  %vm2132_vm14 = vcmp.eq.s32.totalorder %v4005_v51, %v2107_v59  ;;  %vm2136_vm4 = vcmp.eq.s32.totalorder %v4024_v44, %v2107_v59 }
 0x299   : > { %vm3123_vm11 = vmpackc.low %vm2124_vm8, %vm2120_vm7  ;;  %vm2140_vm5 = vcmp.eq.s32.totalorder %v4027_v45, %v2107_v59  ;;  %vm2149_vm7 = vcmp.eq.s32.totalorder %v4047_v63, %v4213_v4  ;;  %v4315_v54 = vrot.slane %v4206_v46, %v1178_v2  ;;  %vm2144_vm10 = vcmp.eq.s32.totalorder %v4044_v62, %v2107_v59 }
 0x29a   : > { %v1960_v3 = vpop.f32.mrf.mxu1  ;;  %vm3127_vm2 = vmpackc.low %vm2132_vm14, %vm2128_vm13 }
 0x29b   : > { %vm3131_vm8 = vmpackc.low %vm2140_vm5, %vm2136_vm4  ;;  %vm2127_vm13 = vcmp.eq.s32.totalorder %v3934_v39, %v4315_v54  ;;  %vm2135_vm4 = vcmp.eq.s32.totalorder %v4005_v51, %v4315_v54 }
 0x29c   : > { %v3517_v6 = vpop.f32.mrf.mxu1  ;;  %vm3133_vm9 = vmpackc.low %vm2149_vm7, %vm2145_vm6 }
 0x29d   : > { %v2255_v40 = vpack.c.bf16 %v3517_v6, %v3516_v1 }
 0x29e   : > { %v1963_v9 = vpop.f32.mrf.mxu1 }
 0x29f   : > { %v2254_v10 = vpack.c.bf16 %v1963_v9, %v1960_v3  ;;  %3325 = vmatprep.subr.bf16.mxu0 %v2255_v40 }
 0x2a0   : > { %v4246_v37 = vpop.f32.mrf.mxu1  ;;  %3326 = vmatpush3.bf16.msra.mxu0 %v2247_v7 }
 0x2a1   : > { %3327 = vmatprep.subr.bf16.mxu0 %v2254_v10 }
 0x2a2   : > { %v4248_v13 = vpop.f32.mrf.mxu1 }
 0x2a4   : > { %v4250_v30 = vpop.f32.mrf.mxu1  ;;  %3328 = vmatpush3.bf16.msra.mxu0 %v2246_v12 }
 0x2a5   : > { %v2257_v52 = vpack.c.bf16 %v4250_v30, %v4246_v37  ;;  %3329 = vmatprep.subr.bf16.mxu0 %v2253_v28 }
 0x2a6   : > { %v4254_v22 = vpop.f32.mrf.mxu1 }
 0x2a7   : > { %v2256_v1 = vpack.c.bf16 %v4254_v22, %v4248_v13 }
 0x2a8   : > { %v4258_v3 = vpop.f32.mrf.mxu1  ;;  %3330 = vmatpush3.bf16.msra.mxu0 %v2245_v50 }
 0x2a9   : > { %3331 = vmatprep.subr.bf16.mxu0 %v2252_v26 }
 0x2aa   : > { %v4260_v29 = vpop.f32.mrf.mxu1 }
 0x2ac   : > { %v4262_v43 = vpop.f32.mrf.mxu1  ;;  %3332 = vmatpush3.bf16.msra.mxu0 %v2244_v24 }
 0x2ad   : > { %v2259_v38 = vpack.c.bf16 %v4262_v43, %v4258_v3  ;;  %3333 = vmatprep.subr.bf16.mxu0 %v2251_v42  ;;  %v1292_v43 = vld [vmem:[#allocation2] sm:$0xff] }
 0x2ae   : > { %v4266_v19 = vpop.f32.mrf.mxu1 }
 0x2af   : > { %v2258_v0 = vpack.c.bf16 %v4266_v19, %v4260_v29 }
 0x2b0   : > { %v4270_v6 = vpop.f32.mrf.mxu1  ;;  %3334 = vmatpush3.bf16.msra.mxu0 %v2243_v48 }
 0x2b1   : > { %3335 = vmatprep.subr.bf16.mxu0 %v2250_v61 }
 0x2b2   : > { %v4272_v17 = vpop.f32.mrf.mxu1 }
 0x2b4   : > { %v4274_v55 = vpop.f32.mrf.mxu1  ;;  %3336 = vmatpush3.bf16.msra.mxu0 %v2242_v27 }
 0x2b5   : > { %3337 = vmatprep.subr.bf16.mxu0 %v2249_v21 }
 0x2b6   : > { %v4278_v40 = vpop.f32.mrf.mxu1 }
 0x2b8   : > { %v3532_v53 = vpop.f32.mrf.mxu1  ;;  %3338 = vmatpush3.bf16.msra.mxu0 %v2241_v20 }
 0x2b9   : > { %3339 = vmatprep.subr.bf16.mxu0 %v2248_v58 }
 0x2ba   : > { %v2024_v48 = vpop.f32.mrf.mxu1 }
 0x2bc   : > { %v3533_v27 = vpop.f32.mrf.mxu1  ;;  %3340 = vmatpush3.bf16.msra.mxu0 %v2240_v25 }
 0x2bd   : > { %v2263_v26 = vpack.c.bf16 %v3533_v27, %v3532_v53  ;;  %v1293_v27 = vld [vmem:[#allocation2 + $0x8] sm:$0xff] }
 0x2be   : > { %v2027_v14 = vpop.f32.mrf.mxu1 }
 0x2bf   : > { %3124 = vmatmul.mubr.msk.bf16.vlgmr.msra.gmra.mxu0 %vm3123_vm11, %v4486_v41  ;;  %vm2148_vm11 = vcmp.eq.s32.totalorder %v4047_v63, %v2107_v59  ;;  %v2262_v61 = vpack.c.bf16 %v2027_v14, %v2024_v48  ;;  %v2261_v59 = vpack.c.bf16 %v4274_v55, %v4270_v6  ;;  %v2115_v6 = vrot.slane %v4206_v46, %v1174_v34 }
 0x2c0   : > { %v4293_v18 = vpop.f32.mrf.mxu1  ;;  %3126 = vmatprep.mubr.msk.bf16.mxu0 %vm3125_vm12, %v4486_v41  ;;  %vm2123_vm12 = vcmp.eq.s32.totalorder %v3923_v36, %v4315_v54  ;;  %vm3135_vm14 = vmpackc.low %vm2148_vm11, %vm2144_vm10  ;;  %v4489_v34 = vmov 1.0|1.0   ;;  %vm2143_vm10 = vcmp.eq.s32.totalorder %v4027_v45, %v4315_v54  ;;  %v1462_v55 = vadd.f32 %v4195_v33, %v1292_v43 }
 0x2c1   : > { %vm3137_vm15 = vmpackc.low %vm2127_vm13, %vm2123_vm12  ;;  %vm2122_vm1 = vcmp.eq.s32.totalorder %v3923_v36, %v2115_v6  ;;  %vm2130_vm7 = vcmp.eq.s32.totalorder %v4002_v57, %v2115_v6  ;;  %vm2138_vm13 = vcmp.eq.s32.totalorder %v4024_v44, %v2115_v6 }
 0x2c2   : > { %v4298_v20 = vpop.f32.mrf.mxu1 }
 0x2c4   : > { %v3537_v16 = vpop.f32.mrf.mxu1 }
 0x2c5   : > { %v2265_v48 = vpack.c.bf16 %v3537_v16, %v4293_v18 }
 0x2c6   : > { %v2043_v23 = vpop.f32.mrf.mxu1 }
 0x2c7   : > { %3128 = vmatmul.mubr.msk.bf16.gmra.mxu0 %vm3127_vm2, %v4486_v41  ;;  %vm2126_vm2 = vcmp.eq.s32.totalorder %v3934_v39, %v2115_v6 }
 0x2c8   : > { %v3540_v25 = vpop.f32.mrf.mxu1  ;;  %3130 = vmatprep.mubr.msk.bf16.mxu0 %vm3129_vm3, %v4486_v41  ;;  %vm2131_vm3 = vcmp.eq.s32.totalorder %v4002_v57, %v4315_v54  ;;  %vm3139_vm5 = vmpackc.low %vm2126_vm2, %vm2122_vm1  ;;  %vm2151_vm1 = vcmp.eq.s32.totalorder %v4047_v63, %v4315_v54 }
 0x2c9   : > { %vm3141_vm6 = vmpackc.low %vm2135_vm4, %vm2131_vm3  ;;  %vm2146_vm4 = vcmp.eq.s32.totalorder %v4044_v62, %v2115_v6 }
 0x2ca   : > { %v2056_v31 = vpop.f32.mrf.mxu1 }
 0x2cc   : > { %v3541_v32 = vpop.f32.mrf.mxu1 }
 0x2ce   : > { %v2059_v35 = vpop.f32.mrf.mxu1 }
 0x2cf   : > { %3132 = vmatmul.mubr.msk.bf16.gmra.mxu0 %vm3131_vm8, %v4486_v41  ;;  %v2266_v53 = vpack.c.bf16 %v2059_v35, %v2056_v31  ;;  %vm2134_vm8 = vcmp.eq.s32.totalorder %v4005_v51, %v2115_v6 }
 0x2d0   : > { %v3544_v7 = vpop.f32.mrf.mxu1  ;;  %3134 = vmatprep.mubr.msk.bf16.mxu0 %vm3133_vm9, %v4486_v41  ;;  %vm2139_vm9 = vcmp.eq.s32.totalorder %v4024_v44, %v4315_v54  ;;  %vm3143_vm11 = vmpackc.low %vm2134_vm8, %vm2130_vm7 }
 0x2d1   : > { %vm3145_vm12 = vmpackc.low %vm2143_vm10, %vm2139_vm9 }
 0x2d2   : > { %v2072_v9 = vpop.f32.mrf.mxu1 }
 0x2d4   : > { %v3545_v4 = vpop.f32.mrf.mxu1 }
 0x2d5   : > { %v2269_v21 = vpack.c.bf16 %v3545_v4, %v3544_v7 }
 0x2d6   : > { %v2075_v2 = vpop.f32.mrf.mxu1 }
 0x2d7   : > { %3136 = vmatmul.mubr.msk.bf16.gmra.mxu0 %vm3135_vm14, %v4486_v41  ;;  %v2268_v58 = vpack.c.bf16 %v2075_v2, %v2072_v9  ;;  %vm2142_vm14 = vcmp.eq.s32.totalorder %v4027_v45, %v2115_v6 }
 0x2d8   : > { %v3548_v10 = vpop.f32.mrf.mxu1  ;;  %3138 = vmatprep.mubr.msk.bf16.mxu0 %vm3137_vm15, %v4486_v41  ;;  %v2260_v41 = vpack.c.bf16 %v4278_v40, %v4272_v17  ;;  %vm2147_vm15 = vcmp.eq.s32.totalorder %v4044_v62, %v4315_v54  ;;  %vm3147_vm2 = vmpackc.low %vm2142_vm14, %vm2138_vm13 }
 0x2d9   : > { %vm3149_vm3 = vmpackc.low %vm2151_vm1, %vm2147_vm15 }
 0x2da   : > { %v2088_v12 = vpop.f32.mrf.mxu1 }
 0x2dc   : > { %v3549_v28 = vpop.f32.mrf.mxu1 }
 0x2dd   : > { %v2271_v50 = vpack.c.bf16 %v3549_v28, %v3548_v10  ;;  %v2267_v10 = vpack.c.bf16 %v3541_v32, %v3540_v25  ;;  %v1463_v25 = vadd.f32 %v4197_v56, %v1293_v27  ;;  %v1294_v32 = vld [vmem:[#allocation2 + $0x10] sm:$0xff] }
 0x2de   : > { %v2091_v24 = vpop.f32.mrf.mxu1  ;;  %v1464_v2 = vadd.f32 %v4199_v60, %v1294_v32 }
 0x2df   : > { %3365 = vmatprep.subr.bf16.mxu0 %v2271_v50  ;;  %v2270_v42 = vpack.c.bf16 %v2091_v24, %v2088_v12  ;;  %v1295_v12 = vld [vmem:[#allocation2 + $0x18] sm:$0xff] }
 0x2e0   : > { %3366 = vmatpush3.bf16.msra.mxu0 %v2263_v26  ;;  %v1465_v56 = vadd.f32 %v4208_v47, %v1295_v12 }
 0x2e1   : > { %3367 = vmatprep.subr.bf16.mxu0 %v2270_v42 }
 0x2e4   : > { %3368 = vmatpush3.bf16.msra.mxu0 %v2262_v61 }
 0x2e5   : > { %3369 = vmatprep.subr.bf16.mxu0 %v2269_v21  ;;  %v1296_v21 = vld [vmem:[#allocation2 + $0x20] sm:$0xff] }
 0x2e6   : > { %v1466_v60 = vadd.f32 %v4215_v5, %v1296_v21 }
 0x2e8   : > { %3370 = vmatpush3.bf16.msra.mxu0 %v2261_v59 }
 0x2e9   : > { %3371 = vmatprep.subr.bf16.mxu0 %v2268_v58 }
 0x2ec   : > { %3372 = vmatpush3.bf16.msra.mxu0 %v2260_v41  ;;  %v2264_v41 = vpack.c.bf16 %v2043_v23, %v4298_v20 }
 0x2ed   : > { %3373 = vmatprep.subr.bf16.mxu0 %v2267_v10 }
 0x2f0   : > { %3374 = vmatpush3.bf16.msra.mxu0 %v2259_v38 }
 0x2f1   : > { %3375 = vmatprep.subr.bf16.mxu0 %v2266_v53 }
 0x2f4   : > { %3376 = vmatpush3.bf16.msra.mxu0 %v2258_v0 }
 0x2f5   : > { %3377 = vmatprep.subr.bf16.mxu0 %v2265_v48 }
 0x2f8   : > { %3378 = vmatpush3.bf16.msra.mxu0 %v2257_v52 }
 0x2f9   : > { %3379 = vmatprep.subr.bf16.mxu0 %v2264_v41  ;;  %v1297_v41 = vld [vmem:[#allocation2 + $0x28] sm:$0xff] }
 0x2fa   : > { %v1467_v47 = vadd.f32 %v4222_v8, %v1297_v41 }
 0x2fc   : > { %3380 = vmatpush3.bf16.msra.mxu0 %v2256_v1 }
 0x2ff   : > { %3140 = vmatmul.mubr.msk.bf16.vlgmr.msra.gmra.mxu0 %vm3139_vm5, %v4489_v34  ;;  %vm2150_vm5 = vcmp.eq.s32.totalorder %v4047_v63, %v2115_v6 }
 0x300   : > { %3142 = vmatprep.mubr.msk.bf16.mxu0 %vm3141_vm6, %v4489_v34  ;;  %vm3151_vm6 = vmpackc.low %vm2150_vm5, %vm2146_vm4 }
 0x307   : > { %3144 = vmatmul.mubr.msk.bf16.gmra.mxu0 %vm3143_vm11, %v4489_v34 }
 0x308   : > { %3146 = vmatprep.mubr.msk.bf16.mxu0 %vm3145_vm12, %v4489_v34 }
 0x30f   : > { %3148 = vmatmul.mubr.msk.bf16.gmra.mxu0 %vm3147_vm2, %v4489_v34 }
 0x310   : > { %3150 = vmatprep.mubr.msk.bf16.mxu0 %vm3149_vm3, %v4489_v34 }
 0x317   : > { %3152 = vmatmul.mubr.msk.bf16.gmra.mxu0 %vm3151_vm6, %v4489_v34 }
 0x37f   : > { %v3341_v36 = vpop.f32.mrf.mxu0 }
 0x381   : > { %v3342_v39 = vpop.f32.mrf.mxu0 }
 0x382   : > { %v3343_v19 = vadd.f32 %v3342_v39, %v3341_v36 }
 0x383   : > { %v3344_v57 = vpop.f32.mrf.mxu0 }
 0x385   : > { %v3345_v51 = vpop.f32.mrf.mxu0 }
 0x386   : > { %v3346_v18 = vadd.f32 %v3345_v51, %v3344_v57 }
 0x387   : > { %v3347_v44 = vpop.f32.mrf.mxu0 }
 0x389   : > { %v3348_v45 = vpop.f32.mrf.mxu0 }
 0x38a   : > { %v3349_v54 = vadd.f32 %v3348_v45, %v3347_v44  ;;  %v1298_v45 = vld [vmem:[#allocation2 + $0x30] sm:$0xff] }
 0x38b   : > { %v3350_v46 = vpop.f32.mrf.mxu0  ;;  %v1468_v5 = vadd.f32 %v4224_v11, %v1298_v45 }
 0x38d   : > { %v3351_v37 = vpop.f32.mrf.mxu0 }
 0x38e   : > { %v3352_v50 = vadd.f32 %v3351_v37, %v3350_v46 }
 0x38f   : > { %v3353_v13 = vpop.f32.mrf.mxu0 }
 0x391   : > { %v3354_v30 = vpop.f32.mrf.mxu0 }
 0x392   : > { %v3355_v58 = vadd.f32 %v3354_v30, %v3353_v13 }
 0x393   : > { %v3356_v52 = vpop.f32.mrf.mxu0 }
 0x395   : > { %v3357_v22 = vpop.f32.mrf.mxu0 }
 0x396   : > { %v3358_v36 = vadd.f32 %v3357_v22, %v3356_v52 }
 0x397   : > { %v3359_v1 = vpop.f32.mrf.mxu0 }
 0x399   : > { %v3360_v3 = vpop.f32.mrf.mxu0 }
 0x39a   : > { %v3361_v37 = vadd.f32 %v3360_v3, %v3359_v1 }
 0x39b   : > { %v4375_v62 = vpop.f32.mrf.mxu0 }
 0x39d   : > { %v4377_v63 = vpop.f32.mrf.mxu0 }
 0x39e   : > { %v3364_v52 = vadd.f32 %v4377_v63, %v4375_v62 }
 0x3bf   : > { %v3381_v29 = vpop.f32.mrf.mxu0 }
 0x3c1   : > { %v3382_v38 = vpop.f32.mrf.mxu0 }
 0x3c2   : > { %v3383_v0 = vadd.f32 %v3382_v38, %v3381_v29  ;;  %v1299_v38 = vld [vmem:[#allocation2 + $0x38] sm:$0xff] }
 0x3c3   : > { %v3384_v17 = vpop.f32.mrf.mxu0  ;;  %v1469_v8 = vadd.f32 %v4228_v15, %v1299_v38 }
 0x3c4   : > { %v2372_v40 = vadd.f32 %v3383_v0, %v3343_v19 }
 0x3c5   : > { %v3385_v14 = vpop.f32.mrf.mxu0 }
 0x3c6   : > { %v2402_v20 = vadd.f32 %v2372_v40, %v1462_v55  ;;  %v3386_v16 = vadd.f32 %v3385_v14, %v3384_v17 }
 0x3c7   : > { %v3387_v23 = vpop.f32.mrf.mxu0 }
 0x3c8   : > { %2410 = vst [vmem:[#allocation2] sm:$0xff] %v2402_v20  ;;  %v2375_v31 = vadd.f32 %v3386_v16, %v3346_v18 }
 0x3c9   : > { %v3388_v35 = vpop.f32.mrf.mxu0 }
 0x3ca   : > { %v2403_v7 = vadd.f32 %v2375_v31, %v1463_v25  ;;  %v3389_v9 = vadd.f32 %v3388_v35, %v3387_v23 }
 0x3cb   : > { %v3390_v4 = vpop.f32.mrf.mxu0 }
 0x3cc   : > { %2411 = vst [vmem:[#allocation2 + $0x8] sm:$0xff] %v2403_v7  ;;  %v2380_v33 = vadd.f32 %v3389_v9, %v3349_v54 }
 0x3cd   : > { %v3391_v28 = vpop.f32.mrf.mxu0 }
 0x3ce   : > { %v2404_v26 = vadd.f32 %v2380_v33, %v1464_v2  ;;  %v3392_v24 = vadd.f32 %v3391_v28, %v3390_v4 }
 0x3cf   : > { %v3393_v42 = vpop.f32.mrf.mxu0 }
 0x3d0   : > { %2412 = vst [vmem:[#allocation2 + $0x10] sm:$0xff] %v2404_v26  ;;  %v2383_v61 = vadd.f32 %v3392_v24, %v3352_v50 }
 0x3d1   : > { %v3394_v59 = vpop.f32.mrf.mxu0 }
 0x3d2   : > { %v2405_v10 = vadd.f32 %v2383_v61, %v1465_v56  ;;  %v3395_v53 = vadd.f32 %v3394_v59, %v3393_v42 }
 0x3d3   : > { %v3396_v48 = vpop.f32.mrf.mxu0 }
 0x3d4   : > { %2413 = vst [vmem:[#allocation2 + $0x18] sm:$0xff] %v2405_v10  ;;  %v2388_v6 = vadd.f32 %v3395_v53, %v3355_v58 }
 0x3d5   : > { %v3397_v34 = vpop.f32.mrf.mxu0 }
 0x3d6   : > { %v2406_v39 = vadd.f32 %v2388_v6, %v1466_v60  ;;  %v3398_v57 = vadd.f32 %v3397_v34, %v3396_v48 }
 0x3d7   : > { %v3399_v51 = vpop.f32.mrf.mxu0 }
 0x3d8   : > { %2414 = vst [vmem:[#allocation2 + $0x20] sm:$0xff] %v2406_v39  ;;  %v2391_v44 = vadd.f32 %v3398_v57, %v3358_v36 }
 0x3d9   : > { %v3400_v46 = vpop.f32.mrf.mxu0 }
 0x3da   : > { %v2407_v13 = vadd.f32 %v2391_v44, %v1467_v47  ;;  %v3401_v30 = vadd.f32 %v3400_v46, %v3399_v51 }
 0x3db   : > { %v3402_v29 = vpop.f32.mrf.mxu0 }
 0x3dc   : > { %2415 = vst [vmem:[#allocation2 + $0x28] sm:$0xff] %v2407_v13  ;;  %v2396_v43 = vadd.f32 %v3401_v30, %v3361_v37 }
 0x3dd   : > { %v3403_v19 = vpop.f32.mrf.mxu0 }
 0x3de   : > { %v2408_v22 = vadd.f32 %v2396_v43, %v1468_v5  ;;  %v3404_v0 = vadd.f32 %v3403_v19, %v3402_v29 }
 0x3e0   : > { %2416 = vst [vmem:[#allocation2 + $0x30] sm:$0xff] %v2408_v22  ;;  %v2399_v17 = vadd.f32 %v3404_v0, %v3364_v52  ;;  %2421 = sbr.rel (%p3153_p6) target bundleno = 1297 (0x511), region = 80 }
 0x3e2   : > { %v2409_v55 = vadd.f32 %v2399_v17, %v1469_v8 }
 0x3e4   : > { %2417 = vst [vmem:[#allocation2 + $0x38] sm:$0xff] %v2409_v55 }
 0x3e5   : > { %v3666_v11 = vld [vmem:[%s4477_s7 + $0x8] sm:$0xff]   ;;  %v3667_v1 = vld [vmem:[%s4477_s7] sm:$0xff]   ;;  %v3739_v3 = vmov 0.0   ;;  %vm3740_vm7 = vmmov 0   ;;  %v2426_v20 = vld [vmem:[%s4474_s4 + $0x10] sm:$0xf] }
 0x3e6   : > { %3562 = vmatprep.subr.bf16.mxu1 %v3739_v3  ;;  %3550 = vmatprep.subr.bf16.mxu0 %v3666_v11  ;;  %v2430_v15 = vld [vmem:[%s4478_s8] sm:$0x1]  ;;  %v2423_v40 = vld [vmem:[%s4474_s4 + $0x4] sm:$0xf]  ;;  %v2424_v27 = vld [vmem:[%s4474_s4 + $0x8] sm:$0xf] }
 0x3e7   : > { %3566 = vmatprep.mubr.msk.bf16.mxu1 %vm3740_vm7, %v3739_v3  ;;  %3551 = vmatpush3.bf16.msra.mxu0 %v3666_v11  ;;  %v2432_v62 = vpack.i.b16 %v2430_v15, %v2430_v15  ;;  %v2422_v63 = vld [vmem:[%s4474_s4] sm:$0xf]  ;;  %v2425_v14 = vld [vmem:[%s4474_s4 + $0xc] sm:$0xf]  ;;  %v2427_v23 = vld [vmem:[%s4474_s4 + $0x14] sm:$0xf] }
 0x3e8   : > { %3552 = vmatprep.subr.bf16.mxu0 %v3667_v1  ;;  %v3668_v16 = vld [vmem:[%s4480_s10 + $0x8] sm:$0xff]   ;;  %v3669_v31 = vld [vmem:[%s4480_s10] sm:$0xff]   ;;  %v2428_v12 = vld [vmem:[%s4474_s4 + $0x18] sm:$0xf] }
 0x3e9   : > { %v2437_v18 = vrot.slane %v2432_v62, %v3991_v49  ;;  %3563 = vmatpush3.bf16.msra.mxu1 %v3668_v16  ;;  %v3670_v4 = vld [vmem:[%s4479_s9] sm:$0xff]   ;;  %v2429_v28 = vld [vmem:[%s4474_s4 + $0x1c] sm:$0xf]  ;;  %v2564_v53 = vld [vmem:[#allocation2 + $0x8] sm:$0xff] }
 0x3ea   : > { %3564 = vmatprep.subr.bf16.mxu1 %v3739_v3  ;;  %v2563_v58 = vld [vmem:[#allocation2] sm:$0xff]  ;;  %v2565_v60 = vld [vmem:[#allocation2 + $0x10] sm:$0xff]  ;;  %v2566_v39 = vld [vmem:[#allocation2 + $0x18] sm:$0xff] }
 0x3eb   : > { %3553 = vmatpush3.bf16.msra.mxu0 %v3667_v1  ;;  %v3154_v25 = vcombine.low %v2437_v18, %v2437_v18  ;;  %v2567_v45 = vld [vmem:[#allocation2 + $0x20] sm:$0xff]  ;;  %v2568_v30 = vld [vmem:[#allocation2 + $0x28] sm:$0xff]  ;;  %v2569_v43 = vld [vmem:[#allocation2 + $0x30] sm:$0xff] }
 0x3ec   : > { %v2570_v22 = vld [vmem:[#allocation2 + $0x38] sm:$0xff] }
 0x3ed   : > { %v2442_v49 = vmul.bf16 %v3154_v25, %v2422_v63  ;;  %v2443_v32 = vmul.bf16 %v3154_v25, %v2423_v40  ;;  %v2444_v35 = vmul.bf16 %v3154_v25, %v2424_v27  ;;  %v2445_v54 = vmul.bf16 %v3154_v25, %v2425_v14  ;;  %3565 = vmatpush3.bf16.msra.mxu1 %v3669_v31 }
 0x3ee   : > { %v2446_v7 = vmul.bf16 %v3154_v25, %v2426_v20  ;;  %v2447_v9 = vmul.bf16 %v3154_v25, %v2427_v23  ;;  %v2448_v26 = vmul.bf16 %v3154_v25, %v2428_v12  ;;  %v2449_v24 = vmul.bf16 %v3154_v25, %v2429_v28 }
 0x3ef   : > { %v3155_v2 = vcombine.low %v2442_v49, %v2443_v32  ;;  %v3156_v33 = vcombine.low %v2444_v35, %v2445_v54 }
 0x3f0   : > { %v3157_v50 = vcombine.low %v2446_v7, %v2447_v9  ;;  %3567 = vmatmul.mubr.msk.bf16.vlgmr.msra.gmra.mxu1 %vm777_vm0, %v3670_v4  ;;  %v3158_v42 = vcombine.low %v2448_v26, %v2449_v24 }
 0x3f1   : > { %3554 = vmatprep.mubr.msk.bf16.mxu0 %vm777_vm0, %v3155_v2 }
 0x3f2   : > { %3555 = vmatmul.mubr.msk.bf16.vlgmr.msra.gmra.mxu0 %vm777_vm0, %v3156_v33 }
 0x3f3   : > { %3558 = vmatprep.mubr.msk.bf16.mxu0 %vm777_vm0, %v3157_v50 }
 0x3fa   : > { %3559 = vmatmul.mubr.msk.bf16.gmra.mxu0 %vm777_vm0, %v3158_v42 }
 0x4b0   : > { %v2771_v61 = vpop.f32.mrf.mxu1 }
 0x4b1   : > { %2778 = vst [vmem:[#allocation4] sm:$0xff] %v2771_v61 }
 0x4b2   : > { %v3556_v56 = vpop.f32.mrf.mxu0  ;;  %v3568_v59 = vpop.f32.mrf.mxu1 }
 0x4b3   : > { %v2573_v51 = vadd.f32 %v3556_v56, %v2565_v60 }
 0x4b4   : > { %v2532_v21 = vpop.f32.mrf.mxu0  ;;  %v2774_v48 = vpop.f32.mrf.mxu1 }
 0x4b5   : > { %2779 = vst [vmem:[#allocation4 + $0x8] sm:$0xff] %v2774_v48  ;;  %v2571_v34 = vadd.f32 %v2563_v58, %v2532_v21 }
 0x4b6   : > { %v3557_v10 = vpop.f32.mrf.mxu0  ;;  %v3569_v41 = vpop.f32.mrf.mxu1 }
 0x4b7   : > { %v2574_v46 = vadd.f32 %v3557_v10, %v2566_v39  ;;  %v3165_v41 = vld [vmem:[%s4481_s11] ss:$0 sm:$0xff] }
 0x4b8   : > { %v2535_v6 = vpop.f32.mrf.mxu0 }
 0x4b9   : > { %v2572_v36 = vadd.f32 %v2564_v53, %v2535_v6 }
 0x4ba   : > { %v3560_v57 = vpop.f32.mrf.mxu0 }
 0x4bb   : > { %v2611_v47 = vadd.f32 %v2572_v36, %v2571_v34  ;;  %v2577_v0 = vadd.f32 %v3560_v57, %v2569_v43 }
 0x4bc   : > { %v2548_v44 = vpop.f32.mrf.mxu0 }
 0x4bd   : > { %v2612_v37 = vadd.f32 %v2611_v47, %v2573_v51  ;;  %v2575_v29 = vadd.f32 %v2567_v45, %v2548_v44 }
 0x4be   : > { %v3561_v13 = vpop.f32.mrf.mxu0 }
 0x4bf   : > { %v2613_v5 = vadd.f32 %v2612_v37, %v2574_v46  ;;  %v2578_v17 = vadd.f32 %v3561_v13, %v2570_v22 }
 0x4c0   : > { %v2551_v38 = vpop.f32.mrf.mxu0 }
 0x4c1   : > { %v2614_v19 = vadd.f32 %v2613_v5, %v2575_v29  ;;  %v2576_v52 = vadd.f32 %v2568_v30, %v2551_v38 }
 0x4c3   : > { %v2615_v8 = vadd.f32 %v2614_v19, %v2576_v52 }
 0x4c5   : > { %v2616_v55 = vadd.f32 %v2615_v8, %v2577_v0 }
 0x4c7   : > { %v2617_v11 = vadd.f32 %v2616_v55, %v2578_v17 }
 0x4c9   : > { %v2618_v1 = vrot.slane %v2617_v11, 4 }
 0x4cb   : > { %v2619_v3 = vadd.f32 %v2618_v1, %v2617_v11 }
 0x4cd   : > { %v2620_v15 = vrot.slane %v2619_v3, 2 }
 0x4cf   : > { %v2621_v62 = vadd.f32 %v2620_v15, %v2619_v3 }
 0x4d1   : > { %v2622_v63 = vrot.slane %v2621_v62, 1 }
 0x4d3   : > { %v2623_v40 = vadd.f32 %v2622_v63, %v2621_v62 }
 0x4d5   : > { %v2624_v27 = vmul.f32 0.015625, %v2623_v40 }
 0x4d7   : > { %v2625_v14 = vsub.f32 %v2571_v34, %v2624_v27  ;;  %v2626_v18 = vsub.f32 %v2572_v36, %v2624_v27  ;;  %v2627_v20 = vsub.f32 %v2573_v51, %v2624_v27  ;;  %v2628_v16 = vsub.f32 %v2574_v46, %v2624_v27  ;;  %v3166_v46 = vld [vmem:[%s4482_s12] ss:$0 sm:$0xff] }
 0x4d8   : > { %v2629_v31 = vsub.f32 %v2575_v29, %v2624_v27  ;;  %v2630_v35 = vsub.f32 %v2576_v52, %v2624_v27  ;;  %v2631_v9 = vsub.f32 %v2577_v0, %v2624_v27  ;;  %v2632_v33 = vsub.f32 %v2578_v17, %v2624_v27 }
 0x4d9   : > { %v2641_v23 = vmul.f32 %v2625_v14, %v2625_v14  ;;  %v2642_v25 = vmul.f32 %v2626_v18, %v2626_v18  ;;  %v2643_v49 = vmul.f32 %v2627_v20, %v2627_v20  ;;  %v2644_v54 = vmul.f32 %v2628_v16, %v2628_v16 }
 0x4da   : > { %v2645_v4 = vmul.f32 %v2629_v31, %v2629_v31  ;;  %v2646_v12 = vmul.f32 %v2630_v35, %v2630_v35  ;;  %v2647_v50 = vmul.f32 %v2631_v9, %v2631_v9  ;;  %v2648_v24 = vmul.f32 %v2632_v33, %v2632_v33 }
 0x4db   : > { %v2649_v32 = vadd.f32 %v2642_v25, %v2641_v23 }
 0x4dd   : > { %v2650_v7 = vadd.f32 %v2649_v32, %v2643_v49 }
 0x4df   : > { %v2651_v2 = vadd.f32 %v2650_v7, %v2644_v54 }
 0x4e1   : > { %v2652_v28 = vadd.f32 %v2651_v2, %v2645_v4 }
 0x4e3   : > { %v2653_v26 = vadd.f32 %v2652_v28, %v2646_v12 }
 0x4e5   : > { %v2654_v42 = vadd.f32 %v2653_v26, %v2647_v50 }
 0x4e7   : > { %v2655_v56 = vadd.f32 %v2654_v42, %v2648_v24 }
 0x4e9   : > { %v2656_v61 = vrot.slane %v2655_v56, 4 }
 0x4eb   : > { %v2657_v21 = vadd.f32 %v2656_v61, %v2655_v56 }
 0x4ed   : > { %v2658_v59 = vrot.slane %v2657_v21, 2 }
 0x4ef   : > { %v2659_v58 = vadd.f32 %v2658_v59, %v2657_v21 }
 0x4f1   : > { %v2660_v10 = vrot.slane %v2659_v58, 1 }
 0x4f3   : > { %v2661_v53 = vadd.f32 %v2660_v10, %v2659_v58 }
 0x4f5   : > { %v2662_v48 = vmul.f32 0.015625, %v2661_v53 }
 0x4f7   : > { %v2663_v60 = vadd.f32 1e-05, %v2662_v48 }
 0x4f9   : > { %3671 = vrsqrt.f32 %v2663_v60 }
 0x506   : > { %v3672_v6 = vpop.eup %3671 }
 0x507   : > { %v2665_v34 = vmul.f32 %v3672_v6, %v2625_v14  ;;  %v2666_v36 = vmul.f32 %v3672_v6, %v2626_v18  ;;  %v2667_v39 = vmul.f32 %v3672_v6, %v2627_v20  ;;  %v2668_v57 = vmul.f32 %v3672_v6, %v2628_v16 }
 0x508   : > { %v2669_v51 = vmul.f32 %v3672_v6, %v2629_v31  ;;  %v2670_v47 = vmul.f32 %v3672_v6, %v2630_v35  ;;  %v2671_v44 = vmul.f32 %v3672_v6, %v2631_v9  ;;  %v2672_v45 = vmul.f32 %v3672_v6, %v2632_v33 }
 0x509   : > { %v2680_v37 = vmul.f32 %v3165_v41, %v2665_v34  ;;  %v2681_v13 = vmul.f32 %v3165_v41, %v2666_v36  ;;  %v2682_v30 = vmul.f32 %v3165_v41, %v2667_v39  ;;  %v2683_v29 = vmul.f32 %v3165_v41, %v2668_v57 }
 0x50a   : > { %v2684_v5 = vmul.f32 %v3165_v41, %v2669_v51  ;;  %v2685_v43 = vmul.f32 %v3165_v41, %v2670_v47  ;;  %v2686_v38 = vmul.f32 %v3165_v41, %v2671_v44  ;;  %v2687_v19 = vmul.f32 %v3165_v41, %v2672_v45 }
 0x50b   : > { %v2695_v52 = vadd.f32 %v3166_v46, %v2680_v37  ;;  %v2696_v22 = vadd.f32 %v3166_v46, %v2681_v13  ;;  %v2697_v0 = vadd.f32 %v3166_v46, %v2682_v30  ;;  %v2698_v8 = vadd.f32 %v3166_v46, %v2683_v29 }
 0x50c   : > { %v2699_v17 = vadd.f32 %v3166_v46, %v2684_v5  ;;  %v2700_v55 = vadd.f32 %v3166_v46, %v2685_v43  ;;  %v2701_v11 = vadd.f32 %v3166_v46, %v2686_v38  ;;  %v2702_v1 = vadd.f32 %v3166_v46, %v2687_v19 }
 0x50d   : > { %2703 = vst [vmem:[#allocation2] sm:$0xff] %v2695_v52  ;;  %2704 = vst [vmem:[#allocation2 + $0x8] sm:$0xff] %v2696_v22 }
 0x50e   : > { %2705 = vst [vmem:[#allocation2 + $0x10] sm:$0xff] %v2697_v0  ;;  %2706 = vst [vmem:[#allocation2 + $0x18] sm:$0xff] %v2698_v8 }
 0x50f   : > { %2707 = vst [vmem:[#allocation2 + $0x20] sm:$0xff] %v2699_v17  ;;  %2708 = vst [vmem:[#allocation2 + $0x28] sm:$0xff] %v2700_v55 }
 0x510   : > { %2709 = vst [vmem:[#allocation2 + $0x30] sm:$0xff] %v2701_v11  ;;  %2710 = vst [vmem:[#allocation2 + $0x38] sm:$0xff] %v2702_v1 }
 0x511 PF: > { %p3578_p7 = scmp.eq.s32.totalorder %s3826_s30, 1  ;;  %s3741_s28 = smov [#allocation2]  }
 0x512   : > { %s2786_s16 = sshll.u32 %s3741_s28, 4  ;;  %s2787_s16 = int_to_ptr.vmem [resolvable:$true] %s2786_s16 }
 0x513   : > { %s3673_s17 = scalar_lea.vmem %s2787_s16, 1024  ;;  %p3680_p11 = scmp.lt.s32.totalorder %s2787_s16, %s2787_s16 }
 0x514   : > { %p3674_p8 = scmp.ne.s32.totalorder %s2787_s16, %s3673_s17  ;;  %p3681_p12 = scmp.lt.s32.totalorder %s3673_s17, %s3673_s17 }
 0x516   : > { %p3675_p9 = pnand %p3674_p8, %p3578_p7  ;;  %p3682_p13 = por %p3681_p12, %p3680_p11 }
 0x518   : > { %p3676_p10 = pneg %p3675_p9 }
 0x51a   : > { %p3683_p0 = pnand %p3682_p13, %p3676_p10 }
 0x51c   : > { %3686 = shalt.err (!%p3683_p0)
}
 0x51d   : > { %s3742_s18 = smov 128   ;;  %s3743_s20 = smov 8  }
 0x51e   : > { %3571 = dma.vmem_to_hbm [thread:$0]  (%p3578_p7), %s2787_s16, 1024, %s4483_s13, [#allocation3], %s3742_s18, %s3742_s18, %s3743_s20  }
 0x51f   : > { %s3744_s19 = smov [#allocation4]  }
 0x520   : > { %s2799_s24 = sshll.u32 %s3744_s19, 4  ;;  %s2800_s24 = int_to_ptr.vmem [resolvable:$true] %s2799_s24 }
 0x521   : > { %s3697_s25 = scalar_lea.vmem %s2800_s24, 256  ;;  %p3704_p4 = scmp.lt.s32.totalorder %s2800_s24, %s2800_s24 }
 0x522   : > { %p3698_p1 = scmp.ne.s32.totalorder %s2800_s24, %s3697_s25  ;;  %p3705_p5 = scmp.lt.s32.totalorder %s3697_s25, %s3697_s25 }
 0x524   : > { %p3699_p2 = pnand %p3698_p1, %p3578_p7  ;;  %p3706_p6 = por %p3705_p5, %p3704_p4 }
 0x526   : > { %p3700_p3 = pneg %p3699_p2 }
 0x528   : > { %p3707_p8 = pnand %p3706_p6, %p3700_p3 }
 0x52a   : > { %3710 = shalt.err (!%p3707_p8)
}
 0x52b   : > { %3573 = dma.vmem_to_hbm [thread:$0]  (%p3578_p7), %s2800_s24, 256, %s4484_s14, [#allocation5], %s3742_s18, %s3742_s18, %s3743_s20  }
 0x52c   : > { %3726 = dma.done.wait (%p3578_p7), [#allocation3], 1024  }
 0x52d   : > { %3728 = vsyncadd (%p3578_p7), [#allocation3], 4294966272 }
 0x52e   : > { %3730 = dma.done.wait (%p3578_p7), [#allocation5], 256  }
 0x52f   : > { %3732 = vsyncadd (%p3578_p7), [#allocation5], 4294967040 }
 0x530 PF: > { %s4490_s27 = sld [smem:[#allocation8_spill]] }
 0x536   : > { %s27_s29 = sadd.s32 1, %s4490_s27  }
 0x537   : > { %p24_p9 = scmp.ge.s32.totalorder %s27_s29, 4  }
 0x539   :  { %26 = sbr.rel (!%p24_p9) target bundleno = 2 (0x2), region = 124 }
 0x53e   :  { %2819 = vsyncpa [#allocation3], 1 }
 0x53f   :  { %2821 = vsyncpa [#allocation3 + $0x1], 1 }
 0x540   :  { %2822 = vsyncpa [#allocation5], 1 }

</bundles_post_ra>
